<compile_context>
chip_gen: v7x
topology: tpu7x:2x2x1
jax: 0.10.0
libtpu: 0.0.40
codegen_flags: <defaults>
</compile_context>

<pallas_src>
import functools
import math

import jax
import jax.numpy as jnp
import numpy as np
from jax.experimental import pallas as pl
from jax.experimental.pallas import tpu as pltpu


def _ms_cam_kernel(pc_ref, pf_ref, s_ref, x_ref, y_ref, o_ref, *,
                   eps, a_l, feat, segmented, bf16_elem):
    # pc_ref: SMEM (3, C)  rows = [wl1, wl2, bias_eff]   (per-channel scalars)
    # pf_ref: VMEM (2, L)  rows = [gamma_l, beta_l] tiled k times along lanes
    # s_ref : VMEM (L, L)  block-diagonal 0/1 segment matrix (only if segmented)
    # x/y/o blocks: (C, tR, L)   (batch dim squeezed; L = k*F packed lanes)
    C, tR, L = x_ref.shape
    inv_f = 1.0 / float(feat)
    cdt = jnp.bfloat16 if bf16_elem else jnp.float32

    # Hoisted out of the channel loop (avoid re-emitting broadcasts per channel).
    gamma = pf_ref[0:1, :].astype(cdt)            # (1, L)
    beta = pf_ref[1:2, :].astype(cdt)             # (1, L)
    seg = s_ref[...] if segmented else None       # (L, L) f32

    def channel(c):
        w1 = pc_ref[0, c]            # local conv1 weight (scalar)
        w2 = pc_ref[1, c]            # local conv2 weight (scalar)
        b_eff = pc_ref[2, c]         # bl2 + folded global-branch constant

        # s = x + y for this channel; stats always in f32.
        sc = x_ref[c].astype(jnp.float32) + y_ref[c].astype(jnp.float32)   # (tR, L)

        # LayerNorm statistics over each original-F segment (two-pass / centered).
        if segmented:
            ssum = jnp.dot(sc, seg, preferred_element_type=jnp.float32,
                           precision=jax.lax.Precision.HIGHEST)            # per-segment sum,
            mu = ssum * inv_f                                              # broadcast per lane
            d = sc - mu
            vsum = jnp.dot(d * d, seg, preferred_element_type=jnp.float32,
                           precision=jax.lax.Precision.HIGHEST)
            var = vsum * inv_f
        else:
            mu = jnp.sum(sc, axis=-1, keepdims=True) * inv_f
            d = sc - mu
            var = jnp.sum(d * d, axis=-1, keepdims=True) * inv_f

        # Folded depthwise conv1 + LayerNorm(F, eps):  bl1 cancels exactly.
        rs = w1 * jax.lax.rsqrt(w1 * w1 * var + eps)
        ln = (d * rs).astype(cdt) * gamma + beta
        act = jnp.where(ln > 0, ln, a_l * ln)                 # PReLU
        z = act * w2.astype(cdt) + b_eff.astype(cdt)          # conv2 + folded global branch
        o_ref[c] = jax.nn.sigmoid(z).astype(o_ref.dtype)

    if C <= 8:
        for c in range(C):            # small C: static unroll
            channel(c)
    else:
        def body(c, carry):           # large C: bounded live ranges
            channel(c)
            return carry
        jax.lax.fori_loop(0, C, body, 0)


def _pick_row_block(R, row_align, max_rows, batch_steps):
    """Rows-per-block: divisor of R, aligned (or full R), fits max_rows, and the
    total parallel grid-step count is >= 2 and even when possible (v7x megacore)."""
    cands = [d for d in range(row_align, R + 1, row_align) if R % d == 0] or [R]
    fitting = [d for d in cands if d <= max_rows] or [cands[0]]
    tR = max(fitting)
    steps = batch_steps * (R // tR)
    if steps < 2 or steps % 2:
        for d in sorted(fitting, reverse=True):
            s = batch_steps * (R // d)
            if s >= 2 and s % 2 == 0:
                tR = d
                break
    return tR


def ms_cam_blk(x, y, conv_w, conv_b, gamma_l, beta_l, *,
               gamma_g, beta_g, a_g, a_l, eps):
    """MS_CAM_BLK forward.

    conv_w / conv_b: (4, C) depthwise 1x1 conv weights/biases,
                     rows = [wg1, wg2, wl1, wl2] / [bg1, bg2, bl1, bl2].
    gamma_l / beta_l: (F,) local LayerNorm affine.
    gamma_g / beta_g: global LayerNorm(1) affine (gamma_g multiplies an exact zero).
    """
    B, C, T, F = x.shape
    itemsize = x.dtype.itemsize

    # ---- fold the input-independent global branch into a per-channel bias ----
    pre = jnp.where(beta_g > 0, beta_g, a_g * beta_g)            # PReLU(beta_g)
    g_const = conv_w[1] * pre + conv_b[1]                        # wg2*PReLU(beta_g)+bg2
    bias_eff = conv_b[3] + g_const                               # bl2 + g_const, (C,)
    pc = jnp.stack([conv_w[2], conv_w[3], bias_eff]).astype(jnp.float32)   # (3, C)

    # ---- lane packing: fold k consecutive T rows into one (k*F)-lane row ----
    k = 1
    if F % 128 != 0:
        kk = 128 // math.gcd(F, 128)
        if kk > 1 and T % kk == 0:
            k = kk
    L, R = k * F, T // k
    segmented = k > 1

    xr = x.reshape(B, C, R, L)        # free row-major reshape (no HBM movement)
    yr = y.reshape(B, C, R, L)

    pf = jnp.stack([jnp.tile(gamma_l.astype(jnp.float32), k),
                    jnp.tile(beta_l.astype(jnp.float32), k)])              # (2, L)
    if segmented:
        seg_id = jnp.arange(L, dtype=jnp.int32) // F
        S = (seg_id[:, None] == seg_id[None, :]).astype(jnp.float32)       # (L, L)
    else:
        S = jnp.zeros((8, 128), jnp.float32)                               # unused dummy

    # ---- chip-aware tiling / VMEM budgeting ----
    try:
        vmem_cap = int(getattr(pltpu.get_tpu_info(), "vmem_capacity_bytes", 128 << 20))
    except Exception:
        vmem_cap = 64 << 20                               # conservative (v7x-sized)
    bf16_elem = False
    if x.dtype == jnp.bfloat16:
        try:
            kind = jax.devices()[0].device_kind.lower()
            bf16_elem = not ("v5 lite" in kind or "v5e" in kind)   # no bf16 VPU on v5e
        except Exception:
            bf16_elem = True

    fixed = 2 * (int(S.size) + int(pf.size)) * 4 + 4 * int(pc.size) + (2 << 20)
    bytes_per_row = 2 * 3 * C * L * itemsize + 8 * L * 4   # dbl-buffered x,y,out + f32 temps
    vmem_target = min(int(0.6 * vmem_cap), 64 << 20)
    max_rows = max(1, (vmem_target - fixed) // bytes_per_row)

    row_align = 16 if itemsize == 2 else 8                 # bf16 packs 2 rows/sublane
    tR = _pick_row_block(R, row_align, max_rows, B)
    grid = (B, R // tR)

    need = 2 * 3 * C * tR * L * itemsize + 8 * tR * L * 4 + fixed
    vmem_limit = int(min(max(need, 32 << 20), int(0.9 * vmem_cap)))

    kernel = functools.partial(_ms_cam_kernel, eps=float(eps), a_l=float(a_l),
                               feat=F, segmented=segmented, bf16_elem=bf16_elem)
    out_r = pl.pallas_call(
        kernel,
        out_shape=jax.ShapeDtypeStruct((B, C, R, L), x.dtype),
        grid_spec=pltpu.PrefetchScalarGridSpec(
            num_scalar_prefetch=0,
            grid=grid,
            in_specs=[
                pl.BlockSpec(memory_space=pltpu.MemorySpace.SMEM),           # pc (3, C)
                pl.BlockSpec((2, L), lambda b, t: (0, 0)),                   # pf (2, L)
                pl.BlockSpec(S.shape, lambda b, t: (0, 0)),                  # segment matrix
                pl.BlockSpec((None, C, tR, L), lambda b, t: (b, 0, t, 0)),   # x
                pl.BlockSpec((None, C, tR, L), lambda b, t: (b, 0, t, 0)),   # y
            ],
            out_specs=pl.BlockSpec((None, C, tR, L), lambda b, t: (b, 0, t, 0)),
        ),
        compiler_params=pltpu.CompilerParams(
            dimension_semantics=("parallel", "parallel"),
            vmem_limit_bytes=vmem_limit,
        ),
    )(pc, pf, S, xr, yr)
    return out_r.reshape(B, C, T, F)


def reference(x, y, conv_w, conv_b, gamma_l, beta_l, *,
              gamma_g, beta_g, a_g, a_l, eps):
    """Pure-JAX faithful reference of MS_CAM_BLK.forward (no folding)."""
    s = x + y

    def cc(v):  # (C,) -> (1, C, 1, 1)
        return v[None, :, None, None]

    wg1, wg2, wl1, wl2 = (cc(conv_w[i]) for i in range(4))
    bg1, bg2, bl1, bl2 = (cc(conv_b[i]) for i in range(4))

    # layer_global: AvgPool(1,F) -> conv(groups=C) -> LayerNorm(1,eps=C) -> PReLU -> conv
    g = jnp.mean(s, axis=-1, keepdims=True)
    g = wg1 * g + bg1
    mu = jnp.mean(g, axis=-1, keepdims=True)
    var = jnp.mean((g - mu) ** 2, axis=-1, keepdims=True)
    g = (g - mu) / jnp.sqrt(var + eps) * gamma_g + beta_g
    g = jnp.where(g > 0, g, a_g * g)
    g = wg2 * g + bg2

    # layer_local: conv(groups=C) -> LayerNorm(F,eps=C) -> PReLU -> conv
    l = wl1 * s + bl1
    mu = jnp.mean(l, axis=-1, keepdims=True)
    var = jnp.mean((l - mu) ** 2, axis=-1, keepdims=True)
    l = (l - mu) / jnp.sqrt(var + eps) * gamma_l + beta_l
    l = jnp.where(l > 0, l, a_l * l)
    l = wl2 * l + bl2

    return jax.nn.sigmoid(g + l)


if __name__ == "__main__":
    B, C, T, F = 2, 4, 16, 16           # B,C,T,F as in the module docstring
    key = jax.random.PRNGKey(0)
    keys = jax.random.split(key, 6)

    x = jax.random.normal(keys[0], (B, C, T, F), dtype=jnp.float32)
    y = jax.random.normal(keys[1], (B, C, T, F), dtype=jnp.float32)

    # Depthwise 1x1 conv params, rows = [wg1, wg2, wl1, wl2] / [bg1, bg2, bl1, bl2].
    conv_w = jax.random.uniform(keys[2], (4, C), minval=-0.5, maxval=0.5,
                                dtype=jnp.float32)
    conv_b = jax.random.uniform(keys[3], (4, C), minval=-0.1, maxval=0.1,
                                dtype=jnp.float32)
    # Local LayerNorm affine over F; global LayerNorm(1) affine; PReLU slopes (0.25).
    gamma_l = (1.0 + 0.1 * jax.random.normal(keys[4], (F,))).astype(jnp.float32)
    beta_l = (0.1 * jax.random.normal(keys[5], (F,))).astype(jnp.float32)
    gamma_g, beta_g = 1.1, 0.05
    a_g, a_l = 0.25, 0.25
    eps = float(C)                      # nn.LayerNorm(_, inp_channels) -> eps = C

    out = ms_cam_blk(x, y, conv_w, conv_b, gamma_l, beta_l,
                     gamma_g=gamma_g, beta_g=beta_g, a_g=a_g, a_l=a_l, eps=eps)
    out = jax.block_until_ready(out)

    ref = reference(x, y, conv_w, conv_b, gamma_l, beta_l,
                    gamma_g=gamma_g, beta_g=beta_g, a_g=a_g, a_l=a_l, eps=eps)
    assert out.shape == (B, C, T, F) and out.dtype == jnp.float32
    np.testing.assert_allclose(np.asarray(out), np.asarray(ref),
                               rtol=5e-5, atol=5e-5)
    print("KERNEL_OK")
</pallas_src>

<mosaic_0001>
module attributes {stable_mosaic.version = 11 : i64} {
  func.func @_ms_cam_kernel(%arg0: i32, %arg1: i32, %arg2: memref<3x4xf32, #tpu.memory_space<smem>>, %arg3: memref<2x128xf32, #tpu.memory_space<vmem>>, %arg4: memref<128x128xf32, #tpu.memory_space<vmem>>, %arg5: memref<1x4x2x128xf32, #tpu.memory_space<vmem>>, %arg6: memref<1x4x2x128xf32, #tpu.memory_space<vmem>>, %arg7: memref<1x4x2x128xf32, #tpu.memory_space<vmem>>) attributes {dimension_semantics = [#tpu.dimension_semantics<parallel>, #tpu.dimension_semantics<parallel>], iteration_bounds = array<i64: 2, 1>, scalar_prefetch = 0 : i64, scratch_operands = 0 : i64, tpu.core_type = #tpu.core_type<tc>, window_params = [{transform_indices = @transform_0, window_bounds = array<i64: 3, 4>}, {pipeline_mode = #tpu.pipeline_mode<synchronous>, transform_indices = @transform_1, window_bounds = array<i64: 2, 128>}, {pipeline_mode = #tpu.pipeline_mode<synchronous>, transform_indices = @transform_2, window_bounds = array<i64: 128, 128>}, {transform_indices = @transform_3, window_bounds = array<i64: 1, 4, 2, 128>}, {transform_indices = @transform_4, window_bounds = array<i64: 1, 4, 2, 128>}, {transform_indices = @transform_5, window_bounds = array<i64: 1, 4, 2, 128>}]} {
    %c0 = arith.constant 0 : index
    %c0_0 = arith.constant 0 : index
    %0 = vector.load %arg3[%c0, %c0_0] : memref<2x128xf32, #tpu.memory_space<vmem>>, vector<1x128xf32>
    %c1 = arith.constant 1 : index
    %c0_1 = arith.constant 0 : index
    %1 = vector.load %arg3[%c1, %c0_1] : memref<2x128xf32, #tpu.memory_space<vmem>>, vector<1x128xf32>
    %c0_2 = arith.constant 0 : index
    %c0_3 = arith.constant 0 : index
    %2 = vector.load %arg4[%c0_2, %c0_3] : memref<128x128xf32, #tpu.memory_space<vmem>>, vector<128x128xf32>
    %c0_4 = arith.constant 0 : index
    %c0_5 = arith.constant 0 : index
    %3 = memref.load %arg2[%c0_4, %c0_5] : memref<3x4xf32, #tpu.memory_space<smem>>
    %c1_6 = arith.constant 1 : index
    %c0_7 = arith.constant 0 : index
    %4 = memref.load %arg2[%c1_6, %c0_7] : memref<3x4xf32, #tpu.memory_space<smem>>
    %c2 = arith.constant 2 : index
    %c0_8 = arith.constant 0 : index
    %5 = memref.load %arg2[%c2, %c0_8] : memref<3x4xf32, #tpu.memory_space<smem>>
    %c0_9 = arith.constant 0 : index
    %c0_10 = arith.constant 0 : index
    %c0_11 = arith.constant 0 : index
    %c0_12 = arith.constant 0 : index
    %6 = vector.load %arg5[%c0_9, %c0_10, %c0_11, %c0_12] : memref<1x4x2x128xf32, #tpu.memory_space<vmem>>, vector<1x1x2x128xf32>
    %7 = vector.shape_cast %6 : vector<1x1x2x128xf32> to vector<2x128xf32>
    %c0_13 = arith.constant 0 : index
    %c0_14 = arith.constant 0 : index
    %c0_15 = arith.constant 0 : index
    %c0_16 = arith.constant 0 : index
    %8 = vector.load %arg6[%c0_13, %c0_14, %c0_15, %c0_16] : memref<1x4x2x128xf32, #tpu.memory_space<vmem>>, vector<1x1x2x128xf32>
    %9 = vector.shape_cast %8 : vector<1x1x2x128xf32> to vector<2x128xf32>
    %10 = arith.addf %7, %9 : vector<2x128xf32>
    %cst = arith.constant dense<0.000000e+00> : vector<2x128xf32>
    %11 = tpu.matmul %10, %2, %cst {dimension_numbers = #tpu.dot_dimension_numbers<[1], [0], [0], [1], [0, 0, 1, 1], [], []>, precision = #tpu.contract_precision<fp32>} : vector<2x128xf32>, vector<128x128xf32>, vector<2x128xf32> -> vector<2x128xf32>
    %cst_17 = arith.constant 6.250000e-02 : f32
    %12 = vector.broadcast %cst_17 : f32 to vector<2x128xf32>
    %13 = arith.mulf %11, %12 : vector<2x128xf32>
    %14 = arith.subf %10, %13 : vector<2x128xf32>
    %15 = arith.mulf %14, %14 : vector<2x128xf32>
    %cst_18 = arith.constant dense<0.000000e+00> : vector<2x128xf32>
    %16 = tpu.matmul %15, %2, %cst_18 {dimension_numbers = #tpu.dot_dimension_numbers<[1], [0], [0], [1], [0, 0, 1, 1], [], []>, precision = #tpu.contract_precision<fp32>} : vector<2x128xf32>, vector<128x128xf32>, vector<2x128xf32> -> vector<2x128xf32>
    %cst_19 = arith.constant 6.250000e-02 : f32
    %17 = vector.broadcast %cst_19 : f32 to vector<2x128xf32>
    %18 = arith.mulf %16, %17 : vector<2x128xf32>
    %19 = arith.mulf %3, %3 : f32
    %20 = vector.broadcast %19 : f32 to vector<2x128xf32>
    %21 = arith.mulf %20, %18 : vector<2x128xf32>
    %cst_20 = arith.constant 4.000000e+00 : f32
    %22 = vector.broadcast %cst_20 : f32 to vector<2x128xf32>
    %23 = arith.addf %21, %22 : vector<2x128xf32>
    %24 = math.rsqrt %23 : vector<2x128xf32>
    %25 = vector.broadcast %3 : f32 to vector<2x128xf32>
    %26 = arith.mulf %25, %24 : vector<2x128xf32>
    %27 = arith.mulf %14, %26 : vector<2x128xf32>
    %28 = vector.broadcast %0 : vector<1x128xf32> to vector<2x128xf32>
    %29 = arith.mulf %27, %28 : vector<2x128xf32>
    %30 = vector.broadcast %1 : vector<1x128xf32> to vector<2x128xf32>
    %31 = arith.addf %29, %30 : vector<2x128xf32>
    %cst_21 = arith.constant 0.000000e+00 : f32
    %32 = vector.broadcast %cst_21 : f32 to vector<2x128xf32>
    %33 = arith.cmpf ogt, %31, %32 : vector<2x128xf32>
    %cst_22 = arith.constant 2.500000e-01 : f32
    %34 = vector.broadcast %cst_22 : f32 to vector<2x128xf32>
    %35 = arith.mulf %34, %31 : vector<2x128xf32>
    %36 = arith.select %33, %31, %35 : vector<2x128xi1>, vector<2x128xf32>
    %37 = vector.broadcast %4 : f32 to vector<2x128xf32>
    %38 = arith.mulf %36, %37 : vector<2x128xf32>
    %39 = vector.broadcast %5 : f32 to vector<2x128xf32>
    %40 = arith.addf %38, %39 : vector<2x128xf32>
    %41 = arith.negf %40 : vector<2x128xf32>
    %42 = math.exp %41 : vector<2x128xf32>
    %cst_23 = arith.constant 1.000000e+00 : f32
    %43 = vector.broadcast %cst_23 : f32 to vector<2x128xf32>
    %44 = arith.addf %43, %42 : vector<2x128xf32>
    %45 = arith.divf %43, %44 : vector<2x128xf32>
    %c0_24 = arith.constant 0 : index
    %c0_25 = arith.constant 0 : index
    %c0_26 = arith.constant 0 : index
    %c0_27 = arith.constant 0 : index
    %46 = vector.load %arg7[%c0_24, %c0_25, %c0_26, %c0_27] : memref<1x4x2x128xf32, #tpu.memory_space<vmem>>, vector<1x1x2x128xf32>
    %47 = vector.shape_cast %46 : vector<1x1x2x128xf32> to vector<2x128xf32>
    %48 = vector.shape_cast %45 : vector<2x128xf32> to vector<1x1x2x128xf32>
    tpu.vector_store %arg7[%c0_24, %c0_25, %c0_26, %c0_27], %48 {strides = array<i32>} : memref<1x4x2x128xf32, #tpu.memory_space<vmem>>, vector<1x1x2x128xf32>,
    %c0_28 = arith.constant 0 : index
    %c1_29 = arith.constant 1 : index
    %49 = memref.load %arg2[%c0_28, %c1_29] : memref<3x4xf32, #tpu.memory_space<smem>>
    %c1_30 = arith.constant 1 : index
    %c1_31 = arith.constant 1 : index
    %50 = memref.load %arg2[%c1_30, %c1_31] : memref<3x4xf32, #tpu.memory_space<smem>>
    %c2_32 = arith.constant 2 : index
    %c1_33 = arith.constant 1 : index
    %51 = memref.load %arg2[%c2_32, %c1_33] : memref<3x4xf32, #tpu.memory_space<smem>>
    %c0_34 = arith.constant 0 : index
    %c1_35 = arith.constant 1 : index
    %c0_36 = arith.constant 0 : index
    %c0_37 = arith.constant 0 : index
    %52 = vector.load %arg5[%c0_34, %c1_35, %c0_36, %c0_37] : memref<1x4x2x128xf32, #tpu.memory_space<vmem>>, vector<1x1x2x128xf32>
    %53 = vector.shape_cast %52 : vector<1x1x2x128xf32> to vector<2x128xf32>
    %c0_38 = arith.constant 0 : index
    %c1_39 = arith.constant 1 : index
    %c0_40 = arith.constant 0 : index
    %c0_41 = arith.constant 0 : index
    %54 = vector.load %arg6[%c0_38, %c1_39, %c0_40, %c0_41] : memref<1x4x2x128xf32, #tpu.memory_space<vmem>>, vector<1x1x2x128xf32>
    %55 = vector.shape_cast %54 : vector<1x1x2x128xf32> to vector<2x128xf32>
    %56 = arith.addf %53, %55 : vector<2x128xf32>
    %cst_42 = arith.constant dense<0.000000e+00> : vector<2x128xf32>
    %57 = tpu.matmul %56, %2, %cst_42 {dimension_numbers = #tpu.dot_dimension_numbers<[1], [0], [0], [1], [0, 0, 1, 1], [], []>, precision = #tpu.contract_precision<fp32>} : vector<2x128xf32>, vector<128x128xf32>, vector<2x128xf32> -> vector<2x128xf32>
    %cst_43 = arith.constant 6.250000e-02 : f32
    %58 = vector.broadcast %cst_43 : f32 to vector<2x128xf32>
    %59 = arith.mulf %57, %58 : vector<2x128xf32>
    %60 = arith.subf %56, %59 : vector<2x128xf32>
    %61 = arith.mulf %60, %60 : vector<2x128xf32>
    %cst_44 = arith.constant dense<0.000000e+00> : vector<2x128xf32>
    %62 = tpu.matmul %61, %2, %cst_44 {dimension_numbers = #tpu.dot_dimension_numbers<[1], [0], [0], [1], [0, 0, 1, 1], [], []>, precision = #tpu.contract_precision<fp32>} : vector<2x128xf32>, vector<128x128xf32>, vector<2x128xf32> -> vector<2x128xf32>
    %cst_45 = arith.constant 6.250000e-02 : f32
    %63 = vector.broadcast %cst_45 : f32 to vector<2x128xf32>
    %64 = arith.mulf %62, %63 : vector<2x128xf32>
    %65 = arith.mulf %49, %49 : f32
    %66 = vector.broadcast %65 : f32 to vector<2x128xf32>
    %67 = arith.mulf %66, %64 : vector<2x128xf32>
    %cst_46 = arith.constant 4.000000e+00 : f32
    %68 = vector.broadcast %cst_46 : f32 to vector<2x128xf32>
    %69 = arith.addf %67, %68 : vector<2x128xf32>
    %70 = math.rsqrt %69 : vector<2x128xf32>
    %71 = vector.broadcast %49 : f32 to vector<2x128xf32>
    %72 = arith.mulf %71, %70 : vector<2x128xf32>
    %73 = arith.mulf %60, %72 : vector<2x128xf32>
    %74 = vector.broadcast %0 : vector<1x128xf32> to vector<2x128xf32>
    %75 = arith.mulf %73, %74 : vector<2x128xf32>
    %76 = vector.broadcast %1 : vector<1x128xf32> to vector<2x128xf32>
    %77 = arith.addf %75, %76 : vector<2x128xf32>
    %cst_47 = arith.constant 0.000000e+00 : f32
    %78 = vector.broadcast %cst_47 : f32 to vector<2x128xf32>
    %79 = arith.cmpf ogt, %77, %78 : vector<2x128xf32>
    %cst_48 = arith.constant 2.500000e-01 : f32
    %80 = vector.broadcast %cst_48 : f32 to vector<2x128xf32>
    %81 = arith.mulf %80, %77 : vector<2x128xf32>
    %82 = arith.select %79, %77, %81 : vector<2x128xi1>, vector<2x128xf32>
    %83 = vector.broadcast %50 : f32 to vector<2x128xf32>
    %84 = arith.mulf %82, %83 : vector<2x128xf32>
    %85 = vector.broadcast %51 : f32 to vector<2x128xf32>
    %86 = arith.addf %84, %85 : vector<2x128xf32>
    %87 = arith.negf %86 : vector<2x128xf32>
    %88 = math.exp %87 : vector<2x128xf32>
    %cst_49 = arith.constant 1.000000e+00 : f32
    %89 = vector.broadcast %cst_49 : f32 to vector<2x128xf32>
    %90 = arith.addf %89, %88 : vector<2x128xf32>
    %91 = arith.divf %89, %90 : vector<2x128xf32>
    %c0_50 = arith.constant 0 : index
    %c1_51 = arith.constant 1 : index
    %c0_52 = arith.constant 0 : index
    %c0_53 = arith.constant 0 : index
    %92 = vector.load %arg7[%c0_50, %c1_51, %c0_52, %c0_53] : memref<1x4x2x128xf32, #tpu.memory_space<vmem>>, vector<1x1x2x128xf32>
    %93 = vector.shape_cast %92 : vector<1x1x2x128xf32> to vector<2x128xf32>
    %94 = vector.shape_cast %91 : vector<2x128xf32> to vector<1x1x2x128xf32>
    tpu.vector_store %arg7[%c0_50, %c1_51, %c0_52, %c0_53], %94 {strides = array<i32>} : memref<1x4x2x128xf32, #tpu.memory_space<vmem>>, vector<1x1x2x128xf32>,
    %c0_54 = arith.constant 0 : index
    %c2_55 = arith.constant 2 : index
    %95 = memref.load %arg2[%c0_54, %c2_55] : memref<3x4xf32, #tpu.memory_space<smem>>
    %c1_56 = arith.constant 1 : index
    %c2_57 = arith.constant 2 : index
    %96 = memref.load %arg2[%c1_56, %c2_57] : memref<3x4xf32, #tpu.memory_space<smem>>
    %c2_58 = arith.constant 2 : index
    %c2_59 = arith.constant 2 : index
    %97 = memref.load %arg2[%c2_58, %c2_59] : memref<3x4xf32, #tpu.memory_space<smem>>
    %c0_60 = arith.constant 0 : index
    %c2_61 = arith.constant 2 : index
    %c0_62 = arith.constant 0 : index
    %c0_63 = arith.constant 0 : index
    %98 = vector.load %arg5[%c0_60, %c2_61, %c0_62, %c0_63] : memref<1x4x2x128xf32, #tpu.memory_space<vmem>>, vector<1x1x2x128xf32>
    %99 = vector.shape_cast %98 : vector<1x1x2x128xf32> to vector<2x128xf32>
    %c0_64 = arith.constant 0 : index
    %c2_65 = arith.constant 2 : index
    %c0_66 = arith.constant 0 : index
    %c0_67 = arith.constant 0 : index
    %100 = vector.load %arg6[%c0_64, %c2_65, %c0_66, %c0_67] : memref<1x4x2x128xf32, #tpu.memory_space<vmem>>, vector<1x1x2x128xf32>
    %101 = vector.shape_cast %100 : vector<1x1x2x128xf32> to vector<2x128xf32>
    %102 = arith.addf %99, %101 : vector<2x128xf32>
    %cst_68 = arith.constant dense<0.000000e+00> : vector<2x128xf32>
    %103 = tpu.matmul %102, %2, %cst_68 {dimension_numbers = #tpu.dot_dimension_numbers<[1], [0], [0], [1], [0, 0, 1, 1], [], []>, precision = #tpu.contract_precision<fp32>} : vector<2x128xf32>, vector<128x128xf32>, vector<2x128xf32> -> vector<2x128xf32>
    %cst_69 = arith.constant 6.250000e-02 : f32
    %104 = vector.broadcast %cst_69 : f32 to vector<2x128xf32>
    %105 = arith.mulf %103, %104 : vector<2x128xf32>
    %106 = arith.subf %102, %105 : vector<2x128xf32>
    %107 = arith.mulf %106, %106 : vector<2x128xf32>
    %cst_70 = arith.constant dense<0.000000e+00> : vector<2x128xf32>
    %108 = tpu.matmul %107, %2, %cst_70 {dimension_numbers = #tpu.dot_dimension_numbers<[1], [0], [0], [1], [0, 0, 1, 1], [], []>, precision = #tpu.contract_precision<fp32>} : vector<2x128xf32>, vector<128x128xf32>, vector<2x128xf32> -> vector<2x128xf32>
    %cst_71 = arith.constant 6.250000e-02 : f32
    %109 = vector.broadcast %cst_71 : f32 to vector<2x128xf32>
    %110 = arith.mulf %108, %109 : vector<2x128xf32>
    %111 = arith.mulf %95, %95 : f32
    %112 = vector.broadcast %111 : f32 to vector<2x128xf32>
    %113 = arith.mulf %112, %110 : vector<2x128xf32>
    %cst_72 = arith.constant 4.000000e+00 : f32
    %114 = vector.broadcast %cst_72 : f32 to vector<2x128xf32>
    %115 = arith.addf %113, %114 : vector<2x128xf32>
    %116 = math.rsqrt %115 : vector<2x128xf32>
    %117 = vector.broadcast %95 : f32 to vector<2x128xf32>
    %118 = arith.mulf %117, %116 : vector<2x128xf32>
    %119 = arith.mulf %106, %118 : vector<2x128xf32>
    %120 = vector.broadcast %0 : vector<1x128xf32> to vector<2x128xf32>
    %121 = arith.mulf %119, %120 : vector<2x128xf32>
    %122 = vector.broadcast %1 : vector<1x128xf32> to vector<2x128xf32>
    %123 = arith.addf %121, %122 : vector<2x128xf32>
    %cst_73 = arith.constant 0.000000e+00 : f32
    %124 = vector.broadcast %cst_73 : f32 to vector<2x128xf32>
    %125 = arith.cmpf ogt, %123, %124 : vector<2x128xf32>
    %cst_74 = arith.constant 2.500000e-01 : f32
    %126 = vector.broadcast %cst_74 : f32 to vector<2x128xf32>
    %127 = arith.mulf %126, %123 : vector<2x128xf32>
    %128 = arith.select %125, %123, %127 : vector<2x128xi1>, vector<2x128xf32>
    %129 = vector.broadcast %96 : f32 to vector<2x128xf32>
    %130 = arith.mulf %128, %129 : vector<2x128xf32>
    %131 = vector.broadcast %97 : f32 to vector<2x128xf32>
    %132 = arith.addf %130, %131 : vector<2x128xf32>
    %133 = arith.negf %132 : vector<2x128xf32>
    %134 = math.exp %133 : vector<2x128xf32>
    %cst_75 = arith.constant 1.000000e+00 : f32
    %135 = vector.broadcast %cst_75 : f32 to vector<2x128xf32>
    %136 = arith.addf %135, %134 : vector<2x128xf32>
    %137 = arith.divf %135, %136 : vector<2x128xf32>
    %c0_76 = arith.constant 0 : index
    %c2_77 = arith.constant 2 : index
    %c0_78 = arith.constant 0 : index
    %c0_79 = arith.constant 0 : index
    %138 = vector.load %arg7[%c0_76, %c2_77, %c0_78, %c0_79] : memref<1x4x2x128xf32, #tpu.memory_space<vmem>>, vector<1x1x2x128xf32>
    %139 = vector.shape_cast %138 : vector<1x1x2x128xf32> to vector<2x128xf32>
    %140 = vector.shape_cast %137 : vector<2x128xf32> to vector<1x1x2x128xf32>
    tpu.vector_store %arg7[%c0_76, %c2_77, %c0_78, %c0_79], %140 {strides = array<i32>} : memref<1x4x2x128xf32, #tpu.memory_space<vmem>>, vector<1x1x2x128xf32>,
    %c0_80 = arith.constant 0 : index
    %c3 = arith.constant 3 : index
    %141 = memref.load %arg2[%c0_80, %c3] : memref<3x4xf32, #tpu.memory_space<smem>>
    %c1_81 = arith.constant 1 : index
    %c3_82 = arith.constant 3 : index
    %142 = memref.load %arg2[%c1_81, %c3_82] : memref<3x4xf32, #tpu.memory_space<smem>>
    %c2_83 = arith.constant 2 : index
    %c3_84 = arith.constant 3 : index
    %143 = memref.load %arg2[%c2_83, %c3_84] : memref<3x4xf32, #tpu.memory_space<smem>>
    %c0_85 = arith.constant 0 : index
    %c3_86 = arith.constant 3 : index
    %c0_87 = arith.constant 0 : index
    %c0_88 = arith.constant 0 : index
    %144 = vector.load %arg5[%c0_85, %c3_86, %c0_87, %c0_88] : memref<1x4x2x128xf32, #tpu.memory_space<vmem>>, vector<1x1x2x128xf32>
    %145 = vector.shape_cast %144 : vector<1x1x2x128xf32> to vector<2x128xf32>
    %c0_89 = arith.constant 0 : index
    %c3_90 = arith.constant 3 : index
    %c0_91 = arith.constant 0 : index
    %c0_92 = arith.constant 0 : index
    %146 = vector.load %arg6[%c0_89, %c3_90, %c0_91, %c0_92] : memref<1x4x2x128xf32, #tpu.memory_space<vmem>>, vector<1x1x2x128xf32>
    %147 = vector.shape_cast %146 : vector<1x1x2x128xf32> to vector<2x128xf32>
    %148 = arith.addf %145, %147 : vector<2x128xf32>
    %cst_93 = arith.constant dense<0.000000e+00> : vector<2x128xf32>
    %149 = tpu.matmul %148, %2, %cst_93 {dimension_numbers = #tpu.dot_dimension_numbers<[1], [0], [0], [1], [0, 0, 1, 1], [], []>, precision = #tpu.contract_precision<fp32>} : vector<2x128xf32>, vector<128x128xf32>, vector<2x128xf32> -> vector<2x128xf32>
    %cst_94 = arith.constant 6.250000e-02 : f32
    %150 = vector.broadcast %cst_94 : f32 to vector<2x128xf32>
    %151 = arith.mulf %149, %150 : vector<2x128xf32>
    %152 = arith.subf %148, %151 : vector<2x128xf32>
    %153 = arith.mulf %152, %152 : vector<2x128xf32>
    %cst_95 = arith.constant dense<0.000000e+00> : vector<2x128xf32>
    %154 = tpu.matmul %153, %2, %cst_95 {dimension_numbers = #tpu.dot_dimension_numbers<[1], [0], [0], [1], [0, 0, 1, 1], [], []>, precision = #tpu.contract_precision<fp32>} : vector<2x128xf32>, vector<128x128xf32>, vector<2x128xf32> -> vector<2x128xf32>
    %cst_96 = arith.constant 6.250000e-02 : f32
    %155 = vector.broadcast %cst_96 : f32 to vector<2x128xf32>
    %156 = arith.mulf %154, %155 : vector<2x128xf32>
    %157 = arith.mulf %141, %141 : f32
    %158 = vector.broadcast %157 : f32 to vector<2x128xf32>
    %159 = arith.mulf %158, %156 : vector<2x128xf32>
    %cst_97 = arith.constant 4.000000e+00 : f32
    %160 = vector.broadcast %cst_97 : f32 to vector<2x128xf32>
    %161 = arith.addf %159, %160 : vector<2x128xf32>
    %162 = math.rsqrt %161 : vector<2x128xf32>
    %163 = vector.broadcast %141 : f32 to vector<2x128xf32>
    %164 = arith.mulf %163, %162 : vector<2x128xf32>
    %165 = arith.mulf %152, %164 : vector<2x128xf32>
    %166 = vector.broadcast %0 : vector<1x128xf32> to vector<2x128xf32>
    %167 = arith.mulf %165, %166 : vector<2x128xf32>
    %168 = vector.broadcast %1 : vector<1x128xf32> to vector<2x128xf32>
    %169 = arith.addf %167, %168 : vector<2x128xf32>
    %cst_98 = arith.constant 0.000000e+00 : f32
    %170 = vector.broadcast %cst_98 : f32 to vector<2x128xf32>
    %171 = arith.cmpf ogt, %169, %170 : vector<2x128xf32>
    %cst_99 = arith.constant 2.500000e-01 : f32
    %172 = vector.broadcast %cst_99 : f32 to vector<2x128xf32>
    %173 = arith.mulf %172, %169 : vector<2x128xf32>
    %174 = arith.select %171, %169, %173 : vector<2x128xi1>, vector<2x128xf32>
    %175 = vector.broadcast %142 : f32 to vector<2x128xf32>
    %176 = arith.mulf %174, %175 : vector<2x128xf32>
    %177 = vector.broadcast %143 : f32 to vector<2x128xf32>
    %178 = arith.addf %176, %177 : vector<2x128xf32>
    %179 = arith.negf %178 : vector<2x128xf32>
    %180 = math.exp %179 : vector<2x128xf32>
    %cst_100 = arith.constant 1.000000e+00 : f32
    %181 = vector.broadcast %cst_100 : f32 to vector<2x128xf32>
    %182 = arith.addf %181, %180 : vector<2x128xf32>
    %183 = arith.divf %181, %182 : vector<2x128xf32>
    %c0_101 = arith.constant 0 : index
    %c3_102 = arith.constant 3 : index
    %c0_103 = arith.constant 0 : index
    %c0_104 = arith.constant 0 : index
    %184 = vector.load %arg7[%c0_101, %c3_102, %c0_103, %c0_104] : memref<1x4x2x128xf32, #tpu.memory_space<vmem>>, vector<1x1x2x128xf32>
    %185 = vector.shape_cast %184 : vector<1x1x2x128xf32> to vector<2x128xf32>
    %186 = vector.shape_cast %183 : vector<2x128xf32> to vector<1x1x2x128xf32>
    tpu.vector_store %arg7[%c0_101, %c3_102, %c0_103, %c0_104], %186 {strides = array<i32>} : memref<1x4x2x128xf32, #tpu.memory_space<vmem>>, vector<1x1x2x128xf32>,
    return
  }
  func.func @transform_0(%arg0: i32, %arg1: i32) -> (i32, i32) {
    %c0_i32 = arith.constant 0 : i32
    %c0_i32_0 = arith.constant 0 : i32
    %c0_i32_1 = arith.constant 0 : i32
    return %c0_i32, %c0_i32_0 : i32, i32
  }
  func.func @transform_1(%arg0: i32, %arg1: i32) -> (i32, i32) {
    %c0_i32 = arith.constant 0 : i32
    %c0_i32_0 = arith.constant 0 : i32
    %c0_i32_1 = arith.constant 0 : i32
    return %c0_i32, %c0_i32_0 : i32, i32
  }
  func.func @transform_2(%arg0: i32, %arg1: i32) -> (i32, i32) {
    %c0_i32 = arith.constant 0 : i32
    %c0_i32_0 = arith.constant 0 : i32
    %c0_i32_1 = arith.constant 0 : i32
    return %c0_i32, %c0_i32_0 : i32, i32
  }
  func.func @transform_3(%arg0: i32, %arg1: i32) -> (i32, i32, i32, i32) {
    %c0_i32 = arith.constant 0 : i32
    %c0_i32_0 = arith.constant 0 : i32
    %c0_i32_1 = arith.constant 0 : i32
    return %arg0, %c0_i32, %arg1, %c0_i32_0 : i32, i32, i32, i32
  }
  func.func @transform_4(%arg0: i32, %arg1: i32) -> (i32, i32, i32, i32) {
    %c0_i32 = arith.constant 0 : i32
    %c0_i32_0 = arith.constant 0 : i32
    %c0_i32_1 = arith.constant 0 : i32
    return %arg0, %c0_i32, %arg1, %c0_i32_0 : i32, i32, i32, i32
  }
  func.func @transform_5(%arg0: i32, %arg1: i32) -> (i32, i32, i32, i32) {
    %c0_i32 = arith.constant 0 : i32
    %c0_i32_0 = arith.constant 0 : i32
    %c0_i32_1 = arith.constant 0 : i32
    return %arg0, %c0_i32, %arg1, %c0_i32_0 : i32, i32, i32, i32
  }
}

</mosaic_0001>

<bundles_post_ra>
// kernel: tpu_custom_call.1
= control target key start
LH: loop header
LB: loop body
LE: loop exit
PB: predicated region body
PF: predicated region fallthrough
CT: control target
= control target key end

     0   :  { %s11424_s0 = inlined_call_operand.hbm [shape: f32[3,4], index: 0, kind: input, shape index: {}]   ;;  %s11425_s1 = inlined_call_operand.vmem [shape: f32[2,128], index: 1, kind: input, shape index: {}]   ;;  %s11426_s2 = inlined_call_operand.hbm [shape: f32[128,128], index: 2, kind: input, shape index: {}]   ;;  %s11427_s3 = inlined_call_operand.hbm [shape: f32[2,4,2,128], index: 3, kind: input, shape index: {}]   ;;  %s11428_s4 = inlined_call_operand.hbm [shape: f32[2,4,2,128], index: 4, kind: input, shape index: {}]   ;;  %s11429_s5 = inlined_call_operand.hbm [shape: f32[2,4,2,128], index: 5, kind: output, shape index: {}]  }
   0x1   :  { %11436 = sst [smem:[#allocation15_spill]] %s11427_s3 }
   0x2   :  { %11437 = sst [smem:[#allocation16_spill]] %s11428_s4 }
   0x3   :  { %10 = vsyncpa [#allocation5], 0 }
   0x4   :  { %11 = vsyncpa [#allocation3], 0 }
   0x5   :  { %12 = vsyncpa [#allocation8], 0 }
   0x6   :  { %14 = vsyncpa [#allocation8 + $0x1], 0 }
   0x7   :  { %15 = vsyncpa [#allocation4], 0 }
   0x8   :  { %17 = vsyncpa [#allocation4 + $0x1], 0  ;;  %s9910_s18 = smov 0   ;;  %s9912_s19 = smov 0  }
   0x9   :  { %s9914_s20 = smov 0   ;;  %s9916_s21 = smov 0  }
   0xa   :  { %s9918_s22 = smov 0   ;;  %s9920_s23 = smov 0  }
   0xb LB: > { %s35_s24 = sadd.s32 1, %s9860_s22  ;;  %s107_s25 = sadd.s32 1, %s9852_s20  ;;  %s9864_s23 = sphi %s9920_s23, %s23_s23   ;;  %s9860_s22 = sphi %s9918_s22, %s11461_s22   ;;  %s9856_s21 = sphi %s9916_s21, %s11460_s21   ;;  %s9852_s20 = sphi %s9914_s20, %s11459_s20   ;;  %s9848_s19 = sphi %s9912_s19, %s11458_s19   ;;  %s9844_s18 = sphi %s9910_s18, %s11457_s18  }
   0xc   : > { %p37_p0 = scmp.ge.s32.totalorder %s35_s24, 2  ;;  %p114_p1 = scmp.ne.s32.totalorder %s9852_s20, %s9848_s19 }
   0xd   : > { %p115_p2 = scmp.eq.s32.totalorder %s9864_s23, 0  ;;  %p9586_p5 = scmp.lt.s32.totalorder %s9864_s23, 2 }
   0xe   : > { %s11463_s24 = smov (%p37_p0, %s35_s24), 0  ;;  %s225_s27 = sand.u32 1, %s9864_s23  }
   0xf   : > { %p116_p4 = por %p115_p2, %p114_p1  ;;  %s102_s26 = ssub.s32 %s9860_s22, %s11463_s24 }
  0x10   : > { %p105_p6 = scmp.eq.s32.totalorder %s102_s26, 0  ;;  %s227_s28 = sand.u32 1, %s9852_s20  }
  0x11   : > { %s5821_s29 = sshll.u32 %s9860_s22, 7  ;;  %s9960_s6 = sshll.u32 %s227_s28, 3 }
  0x12   : > { %s9958_s30 = scalar_select %p105_p6, %s9852_s20, %s107_s25  }
  0x13   : > { %s11438_s3 = sld [smem:[#allocation15_spill]]  ;;  %p9969_p7 = pnand %p9586_p5, %p116_p4 }
  0x14   : > { %s229_s11 = scalar_lea.vmem [#allocation7], %s9960_s6  ;;  %s9976_s13 = scalar_lea.sflag [#allocation8], %s225_s27 }
  0x15   : > { %s237_s12 = sshll.u32 %s229_s11, 4  ;;  %p9675_p9 = pneg %p9969_p7  ;;  %s9974_s12 = int_to_ptr.vmem [resolvable:$true] %s237_s12 }
  0x19   : > { %s9967_s9 = scalar_lea.hbm %s11438_s3, %s5821_s29  ;;  %s9678_s17 = scalar_lea.hbm %s11438_s3, 256 }
  0x1a   : > { %s9673_s14 = scalar_lea.hbm %s9967_s9, 128  ;;  %p9679_p12 = scmp.lt.u32.totalorder %s9967_s9, %s11438_s3 }
  0x1b   : > { %p9674_p8 = scmp.ne.s32.totalorder %s9967_s9, %s9673_s14  ;;  %p9680_p13 = scmp.lt.u32.totalorder %s9678_s17, %s9673_s14 }
  0x1c   : > { %p9682_p2 = scmp.lt.u32.totalorder %s9673_s14, %s9967_s9 }
  0x1d   : > { %p9676_p10 = pnand %p9675_p9, %p9674_p8  ;;  %p9681_p0 = por %p9680_p13, %p9679_p12 }
  0x1f   : > { %p9677_p11 = pneg %p9676_p10  ;;  %p9683_p4 = por %p9682_p2, %p9681_p0 }
  0x21   : > { %p9684_p5 = pnand %p9683_p4, %p9677_p11 }
  0x23   : > { %9687 = shalt.err (!%p9684_p5)
}
  0x24   : > { %s9688_s27 = scalar_lea.vmem %s9974_s12, 128  ;;  %s9866_s28 = smov [#allocation7]  }
  0x25   : > { %p9689_p6 = scmp.ne.s32.totalorder %s9974_s12, %s9688_s27  ;;  %s9693_s7 = sshll.u32 %s9866_s28, 4  ;;  %s9694_s7 = int_to_ptr.vmem [resolvable:$false] %s9693_s7 }
  0x26   : > { %s9695_s8 = scalar_lea.vmem %s9694_s7, 256  ;;  %p9696_p3 = scmp.lt.s32.totalorder %s9974_s12, %s9694_s7 }
  0x27   : > { %p9691_p8 = pnand %p9689_p6, %p9675_p9  ;;  %p9697_p12 = scmp.lt.s32.totalorder %s9695_s8, %s9688_s27 }
  0x29   : > { %p9692_p10 = pneg %p9691_p8  ;;  %p9698_p13 = por %p9697_p12, %p9696_p3 }
  0x2b   : > { %p9699_p0 = pnand %p9698_p13, %p9692_p10 }
  0x2d   : > { %9702 = shalt.err (!%p9699_p0)
}
  0x2e   : > { %s11430_s11 = smov 32   ;;  %s11431_s14 = smov 2  }
  0x2f   : > { %9576 = dma.hbm_to_vmem [thread:$0]  (!%p9969_p7), %s9967_s9, 128, %s9974_s12, %s9976_s13, %s11430_s11, %s11430_s11, %s11431_s14  }
  0x30   : > { %s251_s15 = scalar_lea.vmem [#allocation9], %s9960_s6  ;;  %s10009_s17 = sadd.s32 4294967295, %s9864_s23  }
  0x31   : > { %s259_s16 = sshll.u32 %s251_s15, 4  ;;  %s5773_s25 = sadd.s32 4294967294, %s9864_s23   ;;  %s10046_s16 = int_to_ptr.vmem [resolvable:$true] %s259_s16 }
  0x32   : > { %p120_p3 = scmp.ne.s32.totalorder %s9848_s19, %s9844_s18  ;;  %p11432_p11 = scmp.eq.s32.totalorder %s10009_s17, 0 }
  0x33   : > { %p174_p2 = scmp.eq.s32.totalorder %s10009_s17, 1  ;;  %p180_p4 = scmp.eq.s32.totalorder %s5773_s25, 1 }
  0x34   : > { %p5774_p5 = scmp.ge.s32.totalorder %s9864_s23, 1  ;;  %p10019_p6 = por %p11432_p11, %p120_p3 }
  0x35   : > { %p10026_p8 = por %p174_p2, %p114_p1  ;;  %p10030_p10 = por %p180_p4, %p120_p3 }
  0x36   : > { %s11440_s26 = scalar_select %p10019_p6, 1, 0 }
  0x37   : > { %s11441_s6 = scalar_select %p10026_p8, 1, 0 }
  0x38   : > { %s11442_s9 = scalar_select %p10030_p10, 1, 0 }
  0x39   : > { %p187_p12 = scmp.lt.s32.totalorder %s9864_s23, 3  ;;  %s11443_s4 = sld [smem:[#allocation16_spill]] }
  0x3a   : > { %s9869_s8 = smov [#allocation6]  }
  0x3b   : > { %p10042_p13 = pnand %p5774_p5, %p187_p12  ;;  %s211_s15 = sshll.u32 %s9869_s8, 4  ;;  %s10050_s15 = int_to_ptr.vmem [resolvable:$true] %s211_s15 }
  0x3d   : > { %s11444_s7 = scalar_select %p10042_p13, 1, 0 }
  0x3e   : > { %p9566_p1 = pneg %p10042_p13 }
  0x3f   : > { %s10040_s28 = scalar_lea.hbm %s11443_s4, %s5821_s29  ;;  %s9708_s11 = scalar_lea.hbm %s11443_s4, 256 }
  0x40   : > { %p10054_p0 = pnand %p9566_p1, %p11432_p11  ;;  %s9703_s25 = scalar_lea.hbm %s10040_s28, 128 }
  0x41   : > { %p9704_p3 = scmp.ne.s32.totalorder %s10040_s28, %s9703_s25  ;;  %p9709_p5 = scmp.lt.u32.totalorder %s10040_s28, %s11443_s4 }
  0x42   : > { %p9710_p12 = scmp.lt.u32.totalorder %s9708_s11, %s9703_s25  ;;  %p9712_p1 = scmp.lt.u32.totalorder %s9703_s25, %s10040_s28 }
  0x43   : > { %p9706_p2 = pnand %p9704_p3, %p9675_p9 }
  0x44   : > { %p9711_p10 = por %p9710_p12, %p9709_p5 }
  0x45   : > { %p9707_p4 = pneg %p9706_p2 }
  0x46   : > { %p9713_p11 = por %p9712_p1, %p9711_p10 }
  0x48   : > { %p9714_p8 = pnand %p9713_p11, %p9707_p4 }
  0x4a   : > { %9717 = shalt.err (!%p9714_p8)
}
  0x4b   : > { %s9718_s3 = scalar_lea.vmem %s10046_s16, 128  ;;  %s9870_s12 = smov [#allocation9]  }
  0x4c   : > { %p9719_p3 = scmp.ne.s32.totalorder %s10046_s16, %s9718_s3  ;;  %s9723_s27 = sshll.u32 %s9870_s12, 4  ;;  %s9724_s27 = int_to_ptr.vmem [resolvable:$false] %s9723_s27 }
  0x4d   : > { %s9725_s14 = scalar_lea.vmem %s9724_s27, 256  ;;  %p9726_p13 = scmp.lt.s32.totalorder %s10046_s16, %s9724_s27 }
  0x4e   : > { %p9721_p2 = pnand %p9719_p3, %p9675_p9  ;;  %p9727_p5 = scmp.lt.s32.totalorder %s9725_s14, %s9718_s3 }
  0x50   : > { %p9722_p6 = pneg %p9721_p2  ;;  %p9728_p12 = por %p9727_p5, %p9726_p13 }
  0x52   : > { %p9729_p10 = pnand %p9728_p12, %p9722_p6 }
  0x54   : > { %9732 = shalt.err (!%p9729_p10)
}
  0x55   : > { %s11446_s11 = smov 2   ;;  %s11447_s25 = smov 32  }
  0x56   : > { %9579 = dma.hbm_to_vmem [thread:$0]  (!%p9969_p7), %s10040_s28, 128, %s10046_s16, %s9976_s13, %s11447_s25, %s11447_s25, %s11446_s11  }
  0x57   : > { %s9733_s4 = scalar_lea.hbm %s11424_s0, 64  ;;  %p9735_p11 = pneg %p10054_p0 }
  0x58   : > { %p9734_p9 = scmp.ne.s32.totalorder %s11424_s0, %s9733_s4  ;;  %p9740_p13 = scmp.lt.u32.totalorder %s9733_s4, %s11424_s0 }
  0x5a   : > { %p9736_p6 = pnand %p9735_p11, %p9734_p9 }
  0x5c   : > { %p9737_p8 = pneg %p9736_p6 }
  0x5e   : > { %p9742_p4 = pnand %p9740_p13, %p9737_p8 }
  0x60   : > { %9745 = shalt.err (!%p9742_p4)
}
  0x61   : > { %s9871_s13 = smov [#allocation2]   ;;  %s9746_s8 = scalar_lea.hbm %s11426_s2, 2048 }
  0x62   : > { %9569 = dma.hbm_to_smem (!%p10054_p0), %s11424_s0, 64, %s9871_s13, [#allocation5]  }
  0x63   : > { %p9747_p7 = scmp.ne.s32.totalorder %s11426_s2, %s9746_s8  ;;  %p9753_p2 = scmp.lt.u32.totalorder %s9746_s8, %s11426_s2 }
  0x65   : > { %p9749_p1 = pnand %p9747_p7, %p9735_p11 }
  0x67   : > { %p9750_p3 = pneg %p9749_p1 }
  0x69   : > { %p9755_p5 = pnand %p9753_p2, %p9750_p3 }
  0x6b   : > { %9758 = shalt.err (!%p9755_p5)
}
  0x6c   : > { %s9759_s10 = scalar_lea.vmem %s10050_s15, 2048  ;;  %p9767_p6 = scmp.lt.s32.totalorder %s10050_s15, %s10050_s15 }
  0x6d   : > { %p9760_p12 = scmp.ne.s32.totalorder %s10050_s15, %s9759_s10  ;;  %p9768_p8 = scmp.lt.s32.totalorder %s9759_s10, %s9759_s10 }
  0x6f   : > { %p9762_p10 = pnand %p9760_p12, %p9735_p11  ;;  %p9769_p13 = por %p9768_p8, %p9767_p6 }
  0x71   : > { %p9763_p9 = pneg %p9762_p10 }
  0x73   : > { %p9770_p4 = pnand %p9769_p13, %p9763_p9 }
  0x75   : > { %9773 = shalt.err (!%p9770_p4)
}
  0x76   : > { %s9872_s14 = smov 128   ;;  %s9873_s13 = smov 8  }
  0x77   : > { %9572 = dma.hbm_to_vmem [thread:$0]  (!%p10054_p0), %s11426_s2, 2048, %s10050_s15, [#allocation3], %s9872_s14, %s9872_s14, %s9873_s13  }
  0x78   : > { %p11448_p7 = scmp.ne.s32.totalorder %s11444_s7, 0 }
  0x79   : > { %p11449_p11 = scmp.eq.s32.totalorder (!%p11448_p7), %s10009_s17, 0 }
  0x7a   : > { %271 = sbr.rel (%p11448_p7) target bundleno = 1586 (0x632), region = 40 }
  0x81   : > { %9827 = dma.done.wait (%p11449_p11), [#allocation5], 64   ;;  %p11450_p1 = pmov %p11449_p11 }
  0x83   : > { %9829 = vsyncadd (%p11450_p1), [#allocation5], 4294967232  ;;  %p11451_p3 = pmov %p11450_p1 }
  0x84   : > { %p11452_p2 = pmov %p11450_p1 }
  0x85   : > { %9831 = dma.done.wait (%p11451_p3), [#allocation3], 2048  }
  0x86   : > { %9833 = vsyncadd (%p11452_p2), [#allocation3], 4294965248  ;;  %s281_s15 = sand.u32 1, %s10009_s17   ;;  %s283_s29 = sand.u32 1, %s9848_s19  }
  0x87   : > { %s10143_s7 = sshll.u32 %s283_s29, 3  ;;  %s282_s11 = scalar_lea.sflag [#allocation8], %s281_s15 }
  0x88   : > { %s10146_s25 = scalar_lea.vmem [#allocation7], %s10143_s7  ;;  %p11453_p0 = scmp.ne.s32.totalorder %s11440_s26, 0 }
  0x8a   : > { %9835 = dma.done.wait (%p11453_p0), %s282_s11, 256  }
  0x8b   : > { %9837 = vsyncadd (%p11453_p0), %s282_s11, 4294967040  ;;  %s10153_s8 = scalar_lea.vmem [#allocation9], %s10143_s7 }
  0x8c   : > { %299 = sfence }
  0x8d   : > { %v329_v0 = vld [vmem:[#allocation6] sm:$0xff]  ;;  %v330_v1 = vld [vmem:[#allocation6 + $0x8] sm:$0xff]  ;;  %v331_v2 = vld [vmem:[#allocation6 + $0x10] sm:$0xff]  ;;  %v9874_v3 = vmov 0.0|0.0   ;;  %vm9875_vm0 = vmmov 0   ;;  %v9876_v8 = vmov 0.0  }
  0x8e   : > { %8320 = vmatprep.subr.bf16.mxu0 %v9874_v3  ;;  %v352_v4 = vand.u32 4294901760, %v329_v0  ;;  %v355_v5 = vand.u32 4294901760, %v330_v1  ;;  %v332_v6 = vld [vmem:[#allocation6 + $0x18] sm:$0xff]  ;;  %v358_v7 = vand.u32 4294901760, %v331_v2  ;;  %6672 = vmatprep.mubr.msk.f32.mxu0 %vm9875_vm0, %v9876_v8  ;;  %v333_v10 = vld [vmem:[#allocation6 + $0x20] sm:$0xff]  ;;  %v10158_v11 = vld [vmem:[#allocation6 + $0x28] sm:$0xff] }
  0x8f   : > { %v361_v9 = vand.u32 4294901760, %v332_v6  ;;  %8464 = vmatprep.subr.bf16.mxu1 %v9874_v3  ;;  %6882 = vmatprep.mubr.msk.f32.mxu1 %vm9875_vm0, %v9876_v8  ;;  %v364_v14 = vand.u32 4294901760, %v333_v10  ;;  %v367_v15 = vand.u32 4294901760, %v10158_v11  ;;  %v335_v16 = vld [vmem:[#allocation6 + $0x30] sm:$0xff]  ;;  %v336_v17 = vld [vmem:[#allocation6 + $0x38] sm:$0xff]  ;;  %v337_v23 = vld [vmem:[#allocation6 + $0x40] sm:$0xff] }
  0x90   : > { %v10163_v12 = vpack.c.bf16 %v355_v5, %v352_v4  ;;  %v348_v18 = vld [vmem:[%s10146_s25] sm:$0x3]  ;;  %v349_v19 = vld [vmem:[%s10153_s8] sm:$0x3]  ;;  %v370_v21 = vand.u32 4294901760, %v335_v16  ;;  %v373_v22 = vand.u32 4294901760, %v336_v17  ;;  %v10182_v30 = vsub.f32 %v329_v0, %v352_v4 }
  0x91   : > { %v10166_v13 = vpack.c.bf16 %v361_v9, %v358_v7  ;;  %v10175_v20 = vpack.c.bf16 %v367_v15, %v364_v14  ;;  %v338_v24 = vld [vmem:[#allocation6 + $0x48] sm:$0xff]  ;;  %v10179_v25 = vadd.f32 %v349_v19, %v348_v18  ;;  %v339_v26 = vld [vmem:[#allocation6 + $0x50] sm:$0xff]  ;;  %v340_v27 = vld [vmem:[#allocation6 + $0x58] sm:$0xff]  ;;  %v376_v32 = vand.u32 4294901760, %v337_v23  ;;  %s11078_s17 = sld [smem:[#allocation2]]  ;;  %s11152_s13 = scalar_lea.vmem [#allocation10], %s10143_s7 }
  0x92   : > { %8322 = vmatpush3.bf16.msra.mxu0 %v10163_v12  ;;  %8466 = vmatpush3.bf16.msra.mxu1 %v10163_v12  ;;  %v341_v28 = vld [vmem:[#allocation6 + $0x60] sm:$0xff]  ;;  %v342_v29 = vld [vmem:[#allocation6 + $0x68] sm:$0xff]  ;;  %v10185_v31 = vpack.c.bf16 %v373_v22, %v370_v21  ;;  %v379_v33 = vand.u32 4294901760, %v338_v24  ;;  %v343_v34 = vld [vmem:[#allocation6 + $0x70] sm:$0xff]  ;;  %v10187_v36 = vsub.f32 %v330_v1, %v355_v5  ;;  %v382_v38 = vand.u32 4294901760, %v339_v26  ;;  %s5790_s12 = sld [smem:[#allocation2 + $0x80]] }
  0x93   : > { %8323 = vmatprep.subr.bf16.mxu0 %v9874_v3  ;;  %8467 = vmatprep.subr.bf16.mxu1 %v9874_v3  ;;  %v344_v35 = vld [vmem:[#allocation6 + $0x78] sm:$0xff]  ;;  %v10192_v37 = vand.u32 4294901760, %v10179_v25  ;;  %v385_v39 = vand.u32 4294901760, %v340_v27  ;;  %v388_v40 = vand.u32 4294901760, %v341_v28  ;;  %v391_v41 = vand.u32 4294901760, %v342_v29  ;;  %s5791_s3 = sld [smem:[#allocation2 + $0x100]] }
  0x94   : > { %v394_v42 = vand.u32 4294901760, %v343_v34  ;;  %v397_v43 = vand.u32 4294901760, %v344_v35  ;;  %v445_v44 = vand.u32 4294901760, %v10182_v30  ;;  %v10196_v45 = vsub.f32 %v331_v2, %v358_v7  ;;  %s11228_s16 = sld [smem:[#allocation2 + $0x1]]  ;;  %s5802_s11 = sld [smem:[#allocation2 + $0x2]] }
  0x95   : > { %v10199_v46 = vpack.c.bf16 %v379_v33, %v376_v32  ;;  %v452_v47 = vand.u32 4294901760, %v10187_v36  ;;  %v10202_v48 = vsub.f32 %v332_v6, %v361_v9  ;;  %v10204_v49 = vsub.f32 %v333_v10, %v364_v14  ;;  %s5796_s15 = sld [smem:[#allocation2 + $0x81]]  ;;  %s5810_s27 = sld [smem:[#allocation2 + $0x83]] }
  0x96   : > { %8325 = vmatpush3.bf16.msra.mxu0 %v10166_v13  ;;  %8469 = vmatpush3.bf16.msra.mxu1 %v10166_v13  ;;  %v10210_v50 = vsub.f32 %v10179_v25, %v10192_v37  ;;  %v10213_v51 = vpack.c.bf16 %v385_v39, %v382_v38  ;;  %v10215_v52 = vpack.c.bf16 %v391_v41, %v388_v40  ;;  %v459_v55 = vand.u32 4294901760, %v10196_v45  ;;  %s5797_s7 = sld [smem:[#allocation2 + $0x101]]  ;;  %s5811_s4 = sld [smem:[#allocation2 + $0x103]] }
  0x97   : > { %8326 = vmatprep.subr.bf16.mxu0 %v9874_v3  ;;  %8470 = vmatprep.subr.bf16.mxu1 %v9874_v3  ;;  %v10217_v53 = vpack.c.bf16 %v397_v43, %v394_v42  ;;  %v446_v54 = vsub.f32 %v10182_v30, %v445_v44  ;;  %v10222_v56 = vsub.f32 %v10158_v11, %v367_v15  ;;  %v466_v58 = vand.u32 4294901760, %v10202_v48  ;;  %s1637_s26 = smul.f32 %s11078_s17, %s11078_s17  ;;  %s5641_s10 = sshll.u32 %s11152_s13, 4  ;;  %s11372_s10 = int_to_ptr.vmem [resolvable:$true] %s5641_s10 }
  0x98   : > { %v453_v57 = vsub.f32 %v10187_v36, %v452_v47  ;;  %v473_v59 = vand.u32 4294901760, %v10204_v49  ;;  %v10228_v60 = vsub.f32 %v335_v16, %v370_v21  ;;  %v434_v61 = vand.u32 4294901760, %v10210_v50  ;;  %p11454_p12 = scmp.ne.s32.totalorder %s11441_s6, 0 }
  0x99   : > { %v10233_v62 = vsub.f32 %v336_v17, %v373_v22  ;;  %v10235_v63 = vsub.f32 %v337_v23, %v376_v32  ;;  %v10237_v0 = vsub.f32 %v338_v24, %v379_v33  ;;  %v10240_v1 = vsub.f32 %v339_v26, %v382_v38 }
  0x9a   : > { %8328 = vmatpush3.bf16.msra.mxu0 %v10175_v20  ;;  %8472 = vmatpush3.bf16.msra.mxu1 %v10175_v20  ;;  %v10242_v2 = vsub.f32 %v340_v27, %v385_v39  ;;  %v10244_v4 = vsub.f32 %v341_v28, %v388_v40  ;;  %v10246_v5 = vsub.f32 %v342_v29, %v391_v41  ;;  %v447_v6 = vand.u32 4294901760, %v446_v54  ;;  %s2963_s28 = smul.f32 %s11228_s16, %s11228_s16 }
  0x9b   : > { %8329 = vmatprep.subr.bf16.mxu0 %v9874_v3  ;;  %8473 = vmatprep.subr.bf16.mxu1 %v9874_v3  ;;  %v480_v7 = vand.u32 4294901760, %v10222_v56  ;;  %v10249_v9 = vsub.f32 %v343_v34, %v394_v42  ;;  %v10251_v10 = vsub.f32 %v344_v35, %v397_v43  ;;  %v454_v11 = vand.u32 4294901760, %v453_v57 }
  0x9c   : > { %v460_v14 = vsub.f32 %v10196_v45, %v459_v55  ;;  %v467_v15 = vsub.f32 %v10202_v48, %v466_v58  ;;  %v487_v16 = vand.u32 4294901760, %v10228_v60  ;;  %v435_v17 = vsub.f32 %v10210_v50, %v434_v61 }
  0x9d   : > { %v494_v18 = vand.u32 4294901760, %v10233_v62  ;;  %v501_v19 = vand.u32 4294901760, %v10235_v63  ;;  %v508_v21 = vand.u32 4294901760, %v10237_v0  ;;  %v515_v22 = vand.u32 4294901760, %v10240_v1 }
  0x9e   : > { %8331 = vmatpush3.bf16.msra.mxu0 %v10185_v31  ;;  %8475 = vmatpush3.bf16.msra.mxu1 %v10185_v31  ;;  %v522_v23 = vand.u32 4294901760, %v10242_v2  ;;  %v529_v24 = vand.u32 4294901760, %v10244_v4  ;;  %v536_v26 = vand.u32 4294901760, %v10246_v5  ;;  %v543_v27 = vand.u32 4294901760, %v10249_v9 }
  0x9f   : > { %8332 = vmatprep.subr.bf16.mxu0 %v9874_v3  ;;  %8476 = vmatprep.subr.bf16.mxu1 %v9874_v3  ;;  %v550_v28 = vand.u32 4294901760, %v10251_v10  ;;  %v10272_v29 = vpack.c.bf16 %v452_v47, %v445_v44  ;;  %v10274_v32 = vpack.c.bf16 %v466_v58, %v459_v55  ;;  %v10277_v33 = vpack.c.bf16 %v480_v7, %v473_v59 }
  0xa0   : > { %v10279_v34 = vpack.c.bf16 %v494_v18, %v487_v16  ;;  %v10281_v35 = vpack.c.bf16 %v508_v21, %v501_v19  ;;  %v10283_v38 = vpack.c.bf16 %v522_v23, %v515_v22  ;;  %v10286_v39 = vpack.c.bf16 %v536_v26, %v529_v24 }
  0xa1   : > { %v10288_v40 = vpack.c.bf16 %v550_v28, %v543_v27  ;;  %v436_v41 = vand.u32 4294901760, %v435_v17  ;;  %v474_v42 = vsub.f32 %v10204_v49, %v473_v59  ;;  %v10294_v43 = vpack.c.bf16 %v454_v11, %v447_v6 }
  0xa2   : > { %8334 = vmatpush3.bf16.msra.mxu0 %v10199_v46  ;;  %8478 = vmatpush3.bf16.msra.mxu1 %v10199_v46  ;;  %v461_v44 = vand.u32 4294901760, %v460_v14  ;;  %v468_v47 = vand.u32 4294901760, %v467_v15  ;;  %v481_v54 = vsub.f32 %v10222_v56, %v480_v7  ;;  %v488_v55 = vsub.f32 %v10228_v60, %v487_v16 }
  0xa3   : > { %8335 = vmatprep.subr.bf16.mxu0 %v9874_v3  ;;  %8479 = vmatprep.subr.bf16.mxu1 %v9874_v3  ;;  %v475_v58 = vand.u32 4294901760, %v474_v42  ;;  %v495_v6 = vsub.f32 %v10233_v62, %v494_v18  ;;  %v502_v15 = vsub.f32 %v10235_v63, %v501_v19  ;;  %v509_v16 = vsub.f32 %v10237_v0, %v508_v21 }
  0xa4   : > { %v10302_v57 = vpack.c.bf16 %v468_v47, %v461_v44  ;;  %v482_v59 = vand.u32 4294901760, %v481_v54  ;;  %v489_v7 = vand.u32 4294901760, %v488_v55  ;;  %v516_v17 = vsub.f32 %v10240_v1, %v515_v22 }
  0xa5   : > { %v496_v14 = vand.u32 4294901760, %v495_v6  ;;  %v510_v42 = vand.u32 4294901760, %v509_v16  ;;  %v523_v44 = vsub.f32 %v10242_v2, %v522_v23  ;;  %v530_v47 = vsub.f32 %v10244_v4, %v529_v24 }
  0xa6   : > { %8337 = vmatpush3.bf16.msra.mxu0 %v10213_v51  ;;  %8481 = vmatpush3.bf16.msra.mxu1 %v10213_v51  ;;  %v10309_v11 = vpack.c.bf16 %v482_v59, %v475_v58  ;;  %v517_v21 = vand.u32 4294901760, %v516_v17  ;;  %v537_v22 = vsub.f32 %v10246_v5, %v536_v26  ;;  %v544_v55 = vsub.f32 %v10249_v9, %v543_v27 }
  0xa7   : > { %8338 = vmatprep.subr.bf16.mxu0 %v9874_v3  ;;  %8482 = vmatprep.subr.bf16.mxu1 %v9874_v3  ;;  %v10316_v18 = vpack.c.bf16 %v496_v14, %v489_v7  ;;  %v524_v54 = vand.u32 4294901760, %v523_v44  ;;  %v531_v23 = vand.u32 4294901760, %v530_v47  ;;  %v551_v24 = vsub.f32 %v10251_v10, %v550_v28 }
  0xa8   : > { %v538_v59 = vand.u32 4294901760, %v537_v22  ;;  %v545_v7 = vand.u32 4294901760, %v544_v55  ;;  %v10343_v28 = vpack.c.bf16 %v10187_v36, %v10182_v30  ;;  %v10350_v14 = vpack.c.bf16 %v10202_v48, %v10196_v45 }
  0xa9   : > { %v10328_v58 = vpack.c.bf16 %v524_v54, %v517_v21  ;;  %v552_v26 = vand.u32 4294901760, %v551_v24  ;;  %v10358_v30 = vpack.c.bf16 %v10222_v56, %v10204_v49  ;;  %v10364_v36 = vpack.c.bf16 %v10233_v62, %v10228_v60  ;;  %v5799_v60 = vld [vmem:[%s10153_s8 + $0x2] sm:$0x3]  ;;  %v5813_v24 = vld [vmem:[%s10153_s8 + $0x6] sm:$0x3] }
  0xaa   : > { %8340 = vmatpush3.bf16.msra.mxu0 %v10215_v52  ;;  %8484 = vmatpush3.bf16.msra.mxu1 %v10215_v52  ;;  %v10333_v6 = vpack.c.bf16 %v538_v59, %v531_v23  ;;  %v10370_v45 = vpack.c.bf16 %v10237_v0, %v10235_v63  ;;  %v10376_v48 = vpack.c.bf16 %v10242_v2, %v10240_v1  ;;  %v5805_v2 = vld [vmem:[%s10146_s25 + $0x4] sm:$0x3]  ;;  %v5812_v59 = vld [vmem:[%s10146_s25 + $0x6] sm:$0x3] }
  0xab   : > { %8341 = vmatprep.subr.bf16.mxu0 %v9874_v3  ;;  %8485 = vmatprep.subr.bf16.mxu1 %v9874_v3  ;;  %v10337_v27 = vpack.c.bf16 %v552_v26, %v545_v7  ;;  %v10382_v49 = vpack.c.bf16 %v10246_v5, %v10244_v4  ;;  %v10388_v56 = vpack.c.bf16 %v10251_v10, %v10249_v9  ;;  %v5806_v4 = vld [vmem:[%s10153_s8 + $0x4] sm:$0x3]  ;;  %s5803_s8 = sld [smem:[#allocation2 + $0x82]] }
  0xac   : > { %v10585_v5 = vadd.f32 %v5806_v4, %v5805_v2  ;;  %v10828_v7 = vadd.f32 %v5813_v24, %v5812_v59 }
  0xae   : > { %8343 = vmatpush3.bf16.msra.mxu0 %v10217_v53  ;;  %8487 = vmatpush3.bf16.msra.mxu1 %v10217_v53  ;;  %v10590_v9 = vand.u32 4294901760, %v10585_v5  ;;  %v10835_v26 = vand.u32 4294901760, %v10828_v7 }
  0xaf   : > { %8344 = vmatprep.subr.bf16.mxu0 %v9874_v3  ;;  %8488 = vmatprep.subr.bf16.mxu1 %v9874_v3 }
  0xb0   : > { %v10596_v10 = vsub.f32 %v10585_v5, %v10590_v9 }
  0xb1   : > { %6673 = vmatmul.mubr.f32.vlgmr.msra.gmra.mrb[0].mxu0 %v436_v41  ;;  %v503_v41 = vand.u32 4294901760, %v502_v15 }
  0xb2   : > { %8346 = vmatpush3.bf16.msra.mxu0 %v10294_v43  ;;  %6707 = vmatprep.mubr.msk.f32.mxu0 %vm9875_vm0, %v9876_v8 }
  0xb3   : > { %8347 = vmatprep.subr.bf16.mxu0 %v9874_v3  ;;  %v10322_v19 = vpack.c.bf16 %v510_v42, %v503_v41  ;;  %v3079_v41 = vand.u32 4294901760, %v10596_v10 }
  0xb5   : > { %v3080_v47 = vsub.f32 %v10596_v10, %v3079_v41 }
  0xb6   : > { %8349 = vmatpush3.bf16.msra.mxu0 %v10302_v57 }
  0xb7   : > { %8350 = vmatprep.subr.bf16.mxu0 %v9874_v3 }
  0xba   : > { %8352 = vmatpush3.bf16.msra.mxu0 %v10309_v11 }
  0xbb   : > { %8353 = vmatprep.subr.bf16.mxu0 %v9874_v3 }
  0xbe   : > { %8355 = vmatpush3.bf16.msra.mxu0 %v10316_v18 }
  0xbf   : > { %8356 = vmatprep.subr.bf16.mxu0 %v9874_v3 }
  0xc2   : > { %8358 = vmatpush3.bf16.msra.mxu0 %v10322_v19 }
  0xc3   : > { %8359 = vmatprep.subr.bf16.mxu0 %v9874_v3 }
  0xc6   : > { %8361 = vmatpush3.bf16.msra.mxu0 %v10328_v58 }
  0xc7   : > { %8362 = vmatprep.subr.bf16.mxu0 %v9874_v3 }
  0xca   : > { %8364 = vmatpush3.bf16.msra.mxu0 %v10333_v6 }
  0xcb   : > { %8365 = vmatprep.subr.bf16.mxu0 %v9874_v3 }
  0xce   : > { %8367 = vmatpush3.bf16.msra.mxu0 %v10337_v27 }
  0xcf   : > { %8368 = vmatprep.subr.bf16.mxu0 %v9874_v3 }
  0xd1   : > { %6708 = vmatmul.mubr.f32.vlgmr.msra.gmra.mrb[0].mxu0 %v10192_v37 }
  0xd2   : > { %8370 = vmatpush3.bf16.msra.mxu0 %v10343_v28  ;;  %6742 = vmatprep.mubr.msk.f32.mxu0 %vm9875_vm0, %v9876_v8 }
  0xd3   : > { %8371 = vmatprep.subr.bf16.mxu0 %v9874_v3 }
  0xd6   : > { %8373 = vmatpush3.bf16.msra.mxu0 %v10350_v14 }
  0xd7   : > { %8374 = vmatprep.subr.bf16.mxu0 %v9874_v3 }
  0xda   : > { %8376 = vmatpush3.bf16.msra.mxu0 %v10358_v30 }
  0xdb   : > { %8377 = vmatprep.subr.bf16.mxu0 %v9874_v3 }
  0xde   : > { %8379 = vmatpush3.bf16.msra.mxu0 %v10364_v36 }
  0xdf   : > { %8380 = vmatprep.subr.bf16.mxu0 %v9874_v3 }
  0xe2   : > { %8382 = vmatpush3.bf16.msra.mxu0 %v10370_v45 }
  0xe3   : > { %8383 = vmatprep.subr.bf16.mxu0 %v9874_v3 }
  0xe6   : > { %8385 = vmatpush3.bf16.msra.mxu0 %v10376_v48 }
  0xe7   : > { %8386 = vmatprep.subr.bf16.mxu0 %v9874_v3 }
  0xea   : > { %8388 = vmatpush3.bf16.msra.mxu0 %v10382_v49 }
  0xeb   : > { %8389 = vmatprep.subr.bf16.mxu0 %v9874_v3 }
  0xee   : > { %8391 = vmatpush3.bf16.msra.mxu0 %v10388_v56 }
  0xef   : > { %8392 = vmatprep.subr.bf16.mxu0 %v9874_v3 }
  0xf1   : > { %6743 = vmatmul.mubr.f32.vlgmr.msra.gmra.mrb[0].mxu0 %v10210_v50  ;;  %v5798_v50 = vld [vmem:[%s10146_s25 + $0x2] sm:$0x3]  ;;  %s4282_s25 = smul.f32 %s5802_s11, %s5802_s11 }
  0xf2   : > { %8394 = vmatpush3.bf16.msra.mxu0 %v10163_v12  ;;  %6777 = vmatprep.mubr.msk.f32.mxu0 %vm9875_vm0, %v9876_v8 }
  0xf3   : > { %8395 = vmatprep.subr.bf16.mxu0 %v9874_v3 }
  0xf6   : > { %8397 = vmatpush3.bf16.msra.mxu0 %v10166_v13 }
  0xf7   : > { %8398 = vmatprep.subr.bf16.mxu0 %v9874_v3 }
  0xfa   : > { %8400 = vmatpush3.bf16.msra.mxu0 %v10175_v20 }
  0xfb   : > { %8401 = vmatprep.subr.bf16.mxu0 %v9874_v3 }
  0xfe   : > { %8403 = vmatpush3.bf16.msra.mxu0 %v10185_v31 }
  0xff   : > { %8404 = vmatprep.subr.bf16.mxu0 %v9874_v3 }
 0x102   : > { %8406 = vmatpush3.bf16.msra.mxu0 %v10199_v46 }
 0x103   : > { %8407 = vmatprep.subr.bf16.mxu0 %v9874_v3 }
 0x106   : > { %8409 = vmatpush3.bf16.msra.mxu0 %v10213_v51 }
 0x107   : > { %8410 = vmatprep.subr.bf16.mxu0 %v9874_v3 }
 0x10a   : > { %8412 = vmatpush3.bf16.msra.mxu0 %v10215_v52 }
 0x10b   : > { %8413 = vmatprep.subr.bf16.mxu0 %v9874_v3 }
 0x10e   : > { %8415 = vmatpush3.bf16.msra.mxu0 %v10217_v53 }
 0x10f   : > { %8416 = vmatprep.subr.bf16.mxu0 %v9874_v3 }
 0x111   : > { %6778 = vmatmul.mubr.f32.vlgmr.msra.gmra.mrb[0].mxu0 %v434_v61  ;;  %v10460_v61 = vadd.f32 %v5799_v60, %v5798_v50  ;;  %v10843_v50 = vsub.f32 %v10828_v7, %v10835_v26 }
 0x112   : > { %8418 = vmatpush3.bf16.msra.mxu0 %v10272_v29  ;;  %6812 = vmatprep.mubr.msk.f32.mxu0 %vm9875_vm0, %v9876_v8 }
 0x113   : > { %8419 = vmatprep.subr.bf16.mxu0 %v9874_v3 }
 0x116   : > { %8421 = vmatpush3.bf16.msra.mxu0 %v10274_v32 }
 0x117   : > { %8422 = vmatprep.subr.bf16.mxu0 %v9874_v3 }
 0x11a   : > { %8424 = vmatpush3.bf16.msra.mxu0 %v10277_v33 }
 0x11b   : > { %8425 = vmatprep.subr.bf16.mxu0 %v9874_v3 }
 0x11e   : > { %8427 = vmatpush3.bf16.msra.mxu0 %v10279_v34 }
 0x11f   : > { %8428 = vmatprep.subr.bf16.mxu0 %v9874_v3 }
 0x122   : > { %8430 = vmatpush3.bf16.msra.mxu0 %v10281_v35 }
 0x123   : > { %8431 = vmatprep.subr.bf16.mxu0 %v9874_v3 }
 0x126   : > { %8433 = vmatpush3.bf16.msra.mxu0 %v10283_v38 }
 0x127   : > { %8434 = vmatprep.subr.bf16.mxu0 %v9874_v3 }
 0x12a   : > { %8436 = vmatpush3.bf16.msra.mxu0 %v10286_v39 }
 0x12b   : > { %8437 = vmatprep.subr.bf16.mxu0 %v9874_v3 }
 0x12e   : > { %8439 = vmatpush3.bf16.msra.mxu0 %v10288_v40 }
 0x12f   : > { %8440 = vmatprep.subr.bf16.mxu0 %v9874_v3 }
 0x131   : > { %6813 = vmatmul.mubr.f32.vlgmr.msra.gmra.mrb[0].mxu0 %v10192_v37 }
 0x132   : > { %8442 = vmatpush3.bf16.msra.mxu0 %v10163_v12  ;;  %6847 = vmatprep.mubr.msk.f32.mxu0 %vm9875_vm0, %v9876_v8 }
 0x133   : > { %8443 = vmatprep.subr.bf16.mxu0 %v9874_v3 }
 0x136   : > { %8445 = vmatpush3.bf16.msra.mxu0 %v10166_v13 }
 0x137   : > { %8446 = vmatprep.subr.bf16.mxu0 %v9874_v3 }
 0x13a   : > { %8448 = vmatpush3.bf16.msra.mxu0 %v10175_v20 }
 0x13b   : > { %8449 = vmatprep.subr.bf16.mxu0 %v9874_v3 }
 0x13e   : > { %8451 = vmatpush3.bf16.msra.mxu0 %v10185_v31 }
 0x13f   : > { %8452 = vmatprep.subr.bf16.mxu0 %v9874_v3 }
 0x142   : > { %8454 = vmatpush3.bf16.msra.mxu0 %v10199_v46 }
 0x143   : > { %8455 = vmatprep.subr.bf16.mxu0 %v9874_v3 }
 0x146   : > { %8457 = vmatpush3.bf16.msra.mxu0 %v10213_v51 }
 0x147   : > { %8458 = vmatprep.subr.bf16.mxu0 %v9874_v3 }
 0x14a   : > { %8460 = vmatpush3.bf16.msra.mxu0 %v10215_v52 }
 0x14b   : > { %8461 = vmatprep.subr.bf16.mxu0 %v9874_v3 }
 0x14e   : > { %8463 = vmatpush3.bf16.msra.mxu0 %v10217_v53 }
 0x14f   : > { %8608 = vmatprep.subr.bf16.mxu0 %v9874_v3 }
 0x151   : > { %6848 = vmatmul.mubr.f32.vlgmr.msra.gmra.mrb[0].mxu0 %v10192_v37  ;;  %v10465_v37 = vand.u32 4294901760, %v10460_v61 }
 0x152   : > { %8610 = vmatpush3.bf16.msra.mxu0 %v10163_v12  ;;  %7092 = vmatprep.mubr.msk.f32.mxu0 %vm9875_vm0, %v9876_v8 }
 0x153   : > { %8611 = vmatprep.subr.bf16.mxu0 %v9874_v3  ;;  %v10471_v62 = vsub.f32 %v10460_v61, %v10465_v37 }
 0x155   : > { %v1760_v63 = vand.u32 4294901760, %v10471_v62 }
 0x156   : > { %8613 = vmatpush3.bf16.msra.mxu0 %v10166_v13 }
 0x157   : > { %8614 = vmatprep.subr.bf16.mxu0 %v9874_v3  ;;  %v1761_v0 = vsub.f32 %v10471_v62, %v1760_v63 }
 0x159   : > { %v1762_v1 = vand.u32 4294901760, %v1761_v0 }
 0x15a   : > { %8616 = vmatpush3.bf16.msra.mxu0 %v10175_v20 }
 0x15b   : > { %8617 = vmatprep.subr.bf16.mxu0 %v9874_v3 }
 0x15e   : > { %8619 = vmatpush3.bf16.msra.mxu0 %v10185_v31 }
 0x15f   : > { %8620 = vmatprep.subr.bf16.mxu0 %v9874_v3 }
 0x162   : > { %8622 = vmatpush3.bf16.msra.mxu0 %v10199_v46 }
 0x163   : > { %8623 = vmatprep.subr.bf16.mxu0 %v9874_v3 }
 0x166   : > { %8625 = vmatpush3.bf16.msra.mxu0 %v10213_v51 }
 0x167   : > { %8626 = vmatprep.subr.bf16.mxu0 %v9874_v3 }
 0x16a   : > { %8628 = vmatpush3.bf16.msra.mxu0 %v10215_v52 }
 0x16b   : > { %8629 = vmatprep.subr.bf16.mxu0 %v9874_v3 }
 0x16e   : > { %8631 = vmatpush3.bf16.msra.mxu0 %v10217_v53 }
 0x16f   : > { %8632 = vmatprep.subr.bf16.mxu0 %v9874_v3 }
 0x171   : > { %7093 = vmatmul.mubr.f32.vlgmr.msra.gmra.mrb[2].mxu0 %v1762_v1 }
 0x172   : > { %8634 = vmatpush3.bf16.msra.mxu0 %v10294_v43  ;;  %7127 = vmatprep.mubr.msk.f32.mxu0 %vm9875_vm0, %v9876_v8 }
 0x173   : > { %8635 = vmatprep.subr.bf16.mxu0 %v9874_v3 }
 0x176   : > { %8637 = vmatpush3.bf16.msra.mxu0 %v10302_v57 }
 0x177   : > { %8638 = vmatprep.subr.bf16.mxu0 %v9874_v3 }
 0x17a   : > { %8640 = vmatpush3.bf16.msra.mxu0 %v10309_v11 }
 0x17b   : > { %8641 = vmatprep.subr.bf16.mxu0 %v9874_v3 }
 0x17e   : > { %8643 = vmatpush3.bf16.msra.mxu0 %v10316_v18 }
 0x17f   : > { %8644 = vmatprep.subr.bf16.mxu0 %v9874_v3 }
 0x182   : > { %8646 = vmatpush3.bf16.msra.mxu0 %v10322_v19 }
 0x183   : > { %8647 = vmatprep.subr.bf16.mxu0 %v9874_v3 }
 0x186   : > { %8649 = vmatpush3.bf16.msra.mxu0 %v10328_v58 }
 0x187   : > { %8650 = vmatprep.subr.bf16.mxu0 %v9874_v3 }
 0x18a   : > { %8652 = vmatpush3.bf16.msra.mxu0 %v10333_v6 }
 0x18b   : > { %8653 = vmatprep.subr.bf16.mxu0 %v9874_v3 }
 0x18e   : > { %8655 = vmatpush3.bf16.msra.mxu0 %v10337_v27 }
 0x18f   : > { %8656 = vmatprep.subr.bf16.mxu0 %v9874_v3 }
 0x191   : > { %7128 = vmatmul.mubr.f32.vlgmr.msra.gmra.mrb[2].mxu0 %v10465_v37 }
 0x192   : > { %8658 = vmatpush3.bf16.msra.mxu0 %v10343_v28  ;;  %7162 = vmatprep.mubr.msk.f32.mxu0 %vm9875_vm0, %v9876_v8 }
 0x193   : > { %8659 = vmatprep.subr.bf16.mxu0 %v9874_v3 }
 0x196   : > { %8661 = vmatpush3.bf16.msra.mxu0 %v10350_v14 }
 0x197   : > { %8662 = vmatprep.subr.bf16.mxu0 %v9874_v3 }
 0x19a   : > { %8664 = vmatpush3.bf16.msra.mxu0 %v10358_v30 }
 0x19b   : > { %8665 = vmatprep.subr.bf16.mxu0 %v9874_v3 }
 0x19e   : > { %8667 = vmatpush3.bf16.msra.mxu0 %v10364_v36 }
 0x19f   : > { %8668 = vmatprep.subr.bf16.mxu0 %v9874_v3 }
 0x1a2   : > { %8670 = vmatpush3.bf16.msra.mxu0 %v10370_v45 }
 0x1a3   : > { %8671 = vmatprep.subr.bf16.mxu0 %v9874_v3 }
 0x1a6   : > { %8673 = vmatpush3.bf16.msra.mxu0 %v10376_v48 }
 0x1a7   : > { %8674 = vmatprep.subr.bf16.mxu0 %v9874_v3 }
 0x1aa   : > { %8676 = vmatpush3.bf16.msra.mxu0 %v10382_v49 }
 0x1ab   : > { %8677 = vmatprep.subr.bf16.mxu0 %v9874_v3 }
 0x1ae   : > { %8679 = vmatpush3.bf16.msra.mxu0 %v10388_v56 }
 0x1af   : > { %8680 = vmatprep.subr.bf16.mxu0 %v9874_v3 }
 0x1b1   : > { %7163 = vmatmul.mubr.f32.vlgmr.msra.gmra.mrb[2].mxu0 %v10471_v62 }
 0x1b2   : > { %8682 = vmatpush3.bf16.msra.mxu0 %v10163_v12  ;;  %7197 = vmatprep.mubr.msk.f32.mxu0 %vm9875_vm0, %v9876_v8 }
 0x1b3   : > { %8683 = vmatprep.subr.bf16.mxu0 %v9874_v3 }
 0x1b6   : > { %8685 = vmatpush3.bf16.msra.mxu0 %v10166_v13 }
 0x1b7   : > { %8686 = vmatprep.subr.bf16.mxu0 %v9874_v3 }
 0x1ba   : > { %8688 = vmatpush3.bf16.msra.mxu0 %v10175_v20 }
 0x1bb   : > { %8689 = vmatprep.subr.bf16.mxu0 %v9874_v3 }
 0x1be   : > { %8691 = vmatpush3.bf16.msra.mxu0 %v10185_v31 }
 0x1bf   : > { %8692 = vmatprep.subr.bf16.mxu0 %v9874_v3 }
 0x1c2   : > { %8694 = vmatpush3.bf16.msra.mxu0 %v10199_v46 }
 0x1c3   : > { %8695 = vmatprep.subr.bf16.mxu0 %v9874_v3 }
 0x1c6   : > { %8697 = vmatpush3.bf16.msra.mxu0 %v10213_v51 }
 0x1c7   : > { %8698 = vmatprep.subr.bf16.mxu0 %v9874_v3 }
 0x1ca   : > { %8700 = vmatpush3.bf16.msra.mxu0 %v10215_v52 }
 0x1cb   : > { %8701 = vmatprep.subr.bf16.mxu0 %v9874_v3 }
 0x1ce   : > { %8703 = vmatpush3.bf16.msra.mxu0 %v10217_v53 }
 0x1cf   : > { %8704 = vmatprep.subr.bf16.mxu0 %v9874_v3 }
 0x1d1   : > { %7198 = vmatmul.mubr.f32.vlgmr.msra.gmra.mrb[2].mxu0 %v1760_v63  ;;  %v4398_v63 = vand.u32 4294901760, %v10843_v50 }
 0x1d2   : > { %8706 = vmatpush3.bf16.msra.mxu0 %v10272_v29  ;;  %7232 = vmatprep.mubr.msk.f32.mxu0 %vm9875_vm0, %v9876_v8 }
 0x1d3   : > { %8707 = vmatprep.subr.bf16.mxu0 %v9874_v3  ;;  %v4399_v2 = vsub.f32 %v10843_v50, %v4398_v63 }
 0x1d6   : > { %8709 = vmatpush3.bf16.msra.mxu0 %v10274_v32 }
 0x1d7   : > { %8710 = vmatprep.subr.bf16.mxu0 %v9874_v3 }
 0x1da   : > { %8712 = vmatpush3.bf16.msra.mxu0 %v10277_v33 }
 0x1db   : > { %8713 = vmatprep.subr.bf16.mxu0 %v9874_v3 }
 0x1de   : > { %8715 = vmatpush3.bf16.msra.mxu0 %v10279_v34 }
 0x1df   : > { %8716 = vmatprep.subr.bf16.mxu0 %v9874_v3 }
 0x1e2   : > { %8718 = vmatpush3.bf16.msra.mxu0 %v10281_v35 }
 0x1e3   : > { %8719 = vmatprep.subr.bf16.mxu0 %v9874_v3 }
 0x1e6   : > { %8721 = vmatpush3.bf16.msra.mxu0 %v10283_v38 }
 0x1e7   : > { %8722 = vmatprep.subr.bf16.mxu0 %v9874_v3 }
 0x1ea   : > { %8724 = vmatpush3.bf16.msra.mxu0 %v10286_v39 }
 0x1eb   : > { %8725 = vmatprep.subr.bf16.mxu0 %v9874_v3 }
 0x1ee   : > { %8727 = vmatpush3.bf16.msra.mxu0 %v10288_v40 }
 0x1ef   : > { %8728 = vmatprep.subr.bf16.mxu0 %v9874_v3 }
 0x1f1   : > { %7233 = vmatmul.mubr.f32.vlgmr.msra.gmra.mrb[2].mxu0 %v10465_v37 }
 0x1f2   : > { %8730 = vmatpush3.bf16.msra.mxu0 %v10163_v12  ;;  %7267 = vmatprep.mubr.msk.f32.mxu0 %vm9875_vm0, %v9876_v8 }
 0x1f3   : > { %8731 = vmatprep.subr.bf16.mxu0 %v9874_v3 }
 0x1f6   : > { %8733 = vmatpush3.bf16.msra.mxu0 %v10166_v13 }
 0x1f7   : > { %8734 = vmatprep.subr.bf16.mxu0 %v9874_v3 }
 0x1fa   : > { %8736 = vmatpush3.bf16.msra.mxu0 %v10175_v20 }
 0x1fb   : > { %8737 = vmatprep.subr.bf16.mxu0 %v9874_v3 }
 0x1fe   : > { %8739 = vmatpush3.bf16.msra.mxu0 %v10185_v31 }
 0x1ff   : > { %8740 = vmatprep.subr.bf16.mxu0 %v9874_v3 }
 0x202   : > { %8742 = vmatpush3.bf16.msra.mxu0 %v10199_v46 }
 0x203   : > { %8743 = vmatprep.subr.bf16.mxu0 %v9874_v3 }
 0x206   : > { %8745 = vmatpush3.bf16.msra.mxu0 %v10213_v51 }
 0x207   : > { %8746 = vmatprep.subr.bf16.mxu0 %v9874_v3 }
 0x20a   : > { %8748 = vmatpush3.bf16.msra.mxu0 %v10215_v52 }
 0x20b   : > { %8749 = vmatprep.subr.bf16.mxu0 %v9874_v3 }
 0x20e   : > { %8751 = vmatpush3.bf16.msra.mxu0 %v10217_v53 }
 0x20f   : > { %8896 = vmatprep.subr.bf16.mxu0 %v9874_v3 }
 0x211   : > { %7268 = vmatmul.mubr.f32.vlgmr.msra.gmra.mrb[2].mxu0 %v10465_v37 }
 0x212   : > { %8898 = vmatpush3.bf16.msra.mxu0 %v10163_v12  ;;  %7512 = vmatprep.mubr.msk.f32.mxu0 %vm9875_vm0, %v9876_v8 }
 0x213   : > { %8899 = vmatprep.subr.bf16.mxu0 %v9874_v3 }
 0x216   : > { %8901 = vmatpush3.bf16.msra.mxu0 %v10166_v13 }
 0x217   : > { %8902 = vmatprep.subr.bf16.mxu0 %v9874_v3 }
 0x21a   : > { %8904 = vmatpush3.bf16.msra.mxu0 %v10175_v20 }
 0x21b   : > { %8905 = vmatprep.subr.bf16.mxu0 %v9874_v3 }
 0x21e   : > { %8907 = vmatpush3.bf16.msra.mxu0 %v10185_v31 }
 0x21f   : > { %8908 = vmatprep.subr.bf16.mxu0 %v9874_v3 }
 0x222   : > { %8910 = vmatpush3.bf16.msra.mxu0 %v10199_v46 }
 0x223   : > { %8911 = vmatprep.subr.bf16.mxu0 %v9874_v3 }
 0x224   : > { %v988_v15 = vpop.f32.mrb[0].mxu0 }
 0x225   : > { %v992_v16 = vmul.f32 0.0625, %v988_v15  ;;  %v6849_v17 = vpop.f32.mrb[1].mxu0 }
 0x226   : > { %8913 = vmatpush3.bf16.msra.mxu0 %v10213_v51 }
 0x227   : > { %v10603_v42 = vsub.f32 %v10179_v25, %v992_v16  ;;  %8914 = vmatprep.subr.bf16.mxu0 %v9874_v3  ;;  %v3081_v25 = vand.u32 4294901760, %v3080_v47 }
 0x229   : > { %v994_v44 = vmul.f32 %v10603_v42, %v10603_v42 }
 0x22a   : > { %8916 = vmatpush3.bf16.msra.mxu0 %v10215_v52 }
 0x22b   : > { %v10612_v21 = vand.u32 4294901760, %v994_v44  ;;  %8917 = vmatprep.subr.bf16.mxu0 %v9874_v3 }
 0x22d   : > { %v10616_v54 = vsub.f32 %v994_v44, %v10612_v21 }
 0x22e   : > { %8919 = vmatpush3.bf16.msra.mxu0 %v10217_v53 }
 0x22f   : > { %8920 = vmatprep.subr.bf16.mxu0 %v9874_v3  ;;  %v1078_v22 = vand.u32 4294901760, %v10616_v54 }
 0x231   : > { %7513 = vmatmul.mubr.f32.vlgmr.msra.gmra.mrb[4].mxu0 %v3081_v25  ;;  %v1079_v55 = vsub.f32 %v10616_v54, %v1078_v22 }
 0x232   : > { %8922 = vmatpush3.bf16.msra.mxu0 %v10294_v43  ;;  %7547 = vmatprep.mubr.msk.f32.mxu0 %vm9875_vm0, %v9876_v8 }
 0x233   : > { %v1080_v23 = vand.u32 4294901760, %v1079_v55  ;;  %8923 = vmatprep.subr.bf16.mxu0 %v9874_v3 }
 0x235   : > { %6883 = vmatmul.mubr.f32.vlgmr.msra.gmra.mrb[0].mxu1 %v1080_v23 }
 0x236   : > { %8490 = vmatpush3.bf16.msra.mxu1 %v10294_v43  ;;  %8925 = vmatpush3.bf16.msra.mxu0 %v10302_v57 }
 0x237   : > { %8491 = vmatprep.subr.bf16.mxu1 %v9874_v3  ;;  %8926 = vmatprep.subr.bf16.mxu0 %v9874_v3 }
 0x238   : > { %6917 = vmatprep.mubr.msk.f32.mxu1 %vm9875_vm0, %v9876_v8 }
 0x23a   : > { %8493 = vmatpush3.bf16.msra.mxu1 %v10302_v57  ;;  %8928 = vmatpush3.bf16.msra.mxu0 %v10309_v11 }
 0x23b   : > { %8494 = vmatprep.subr.bf16.mxu1 %v9874_v3  ;;  %8929 = vmatprep.subr.bf16.mxu0 %v9874_v3 }
 0x23e   : > { %8496 = vmatpush3.bf16.msra.mxu1 %v10309_v11  ;;  %8931 = vmatpush3.bf16.msra.mxu0 %v10316_v18 }
 0x23f   : > { %8497 = vmatprep.subr.bf16.mxu1 %v9874_v3  ;;  %8932 = vmatprep.subr.bf16.mxu0 %v9874_v3 }
 0x242   : > { %8499 = vmatpush3.bf16.msra.mxu1 %v10316_v18  ;;  %8934 = vmatpush3.bf16.msra.mxu0 %v10322_v19 }
 0x243   : > { %8500 = vmatprep.subr.bf16.mxu1 %v9874_v3  ;;  %8935 = vmatprep.subr.bf16.mxu0 %v9874_v3 }
 0x246   : > { %8502 = vmatpush3.bf16.msra.mxu1 %v10322_v19  ;;  %8937 = vmatpush3.bf16.msra.mxu0 %v10328_v58 }
 0x247   : > { %8503 = vmatprep.subr.bf16.mxu1 %v9874_v3  ;;  %8938 = vmatprep.subr.bf16.mxu0 %v9874_v3 }
 0x24a   : > { %8505 = vmatpush3.bf16.msra.mxu1 %v10328_v58  ;;  %8940 = vmatpush3.bf16.msra.mxu0 %v10333_v6 }
 0x24b   : > { %8506 = vmatprep.subr.bf16.mxu1 %v9874_v3  ;;  %8941 = vmatprep.subr.bf16.mxu0 %v9874_v3 }
 0x24e   : > { %8508 = vmatpush3.bf16.msra.mxu1 %v10333_v6  ;;  %8943 = vmatpush3.bf16.msra.mxu0 %v10337_v27 }
 0x24f   : > { %8509 = vmatprep.subr.bf16.mxu1 %v9874_v3  ;;  %8944 = vmatprep.subr.bf16.mxu0 %v9874_v3 }
 0x251   : > { %7548 = vmatmul.mubr.f32.vlgmr.msra.gmra.mrb[4].mxu0 %v10590_v9 }
 0x252   : > { %8511 = vmatpush3.bf16.msra.mxu1 %v10337_v27  ;;  %8946 = vmatpush3.bf16.msra.mxu0 %v10343_v28 }
 0x253   : > { %8512 = vmatprep.subr.bf16.mxu1 %v9874_v3  ;;  %8947 = vmatprep.subr.bf16.mxu0 %v9874_v3 }
 0x254   : > { %7582 = vmatprep.mubr.msk.f32.mxu0 %vm9875_vm0, %v9876_v8 }
 0x255   : > { %6918 = vmatmul.mubr.f32.vlgmr.msra.gmra.mrb[0].mxu1 %v10612_v21 }
 0x256   : > { %8514 = vmatpush3.bf16.msra.mxu1 %v10343_v28  ;;  %8949 = vmatpush3.bf16.msra.mxu0 %v10350_v14 }
 0x257   : > { %8515 = vmatprep.subr.bf16.mxu1 %v9874_v3  ;;  %8950 = vmatprep.subr.bf16.mxu0 %v9874_v3 }
 0x258   : > { %6952 = vmatprep.mubr.msk.f32.mxu1 %vm9875_vm0, %v9876_v8 }
 0x25a   : > { %8517 = vmatpush3.bf16.msra.mxu1 %v10350_v14  ;;  %8952 = vmatpush3.bf16.msra.mxu0 %v10358_v30 }
 0x25b   : > { %8518 = vmatprep.subr.bf16.mxu1 %v9874_v3  ;;  %8953 = vmatprep.subr.bf16.mxu0 %v9874_v3 }
 0x25e   : > { %8520 = vmatpush3.bf16.msra.mxu1 %v10358_v30  ;;  %8955 = vmatpush3.bf16.msra.mxu0 %v10364_v36 }
 0x25f   : > { %8521 = vmatprep.subr.bf16.mxu1 %v9874_v3  ;;  %8956 = vmatprep.subr.bf16.mxu0 %v9874_v3 }
 0x262   : > { %8523 = vmatpush3.bf16.msra.mxu1 %v10364_v36  ;;  %8958 = vmatpush3.bf16.msra.mxu0 %v10370_v45 }
 0x263   : > { %8524 = vmatprep.subr.bf16.mxu1 %v9874_v3  ;;  %8959 = vmatprep.subr.bf16.mxu0 %v9874_v3 }
 0x266   : > { %8526 = vmatpush3.bf16.msra.mxu1 %v10370_v45  ;;  %8961 = vmatpush3.bf16.msra.mxu0 %v10376_v48 }
 0x267   : > { %8527 = vmatprep.subr.bf16.mxu1 %v9874_v3  ;;  %8962 = vmatprep.subr.bf16.mxu0 %v9874_v3 }
 0x26a   : > { %8529 = vmatpush3.bf16.msra.mxu1 %v10376_v48  ;;  %8964 = vmatpush3.bf16.msra.mxu0 %v10382_v49 }
 0x26b   : > { %8530 = vmatprep.subr.bf16.mxu1 %v9874_v3  ;;  %8965 = vmatprep.subr.bf16.mxu0 %v9874_v3 }
 0x26e   : > { %8532 = vmatpush3.bf16.msra.mxu1 %v10382_v49  ;;  %8967 = vmatpush3.bf16.msra.mxu0 %v10388_v56 }
 0x26f   : > { %8533 = vmatprep.subr.bf16.mxu1 %v9874_v3  ;;  %8968 = vmatprep.subr.bf16.mxu0 %v9874_v3 }
 0x271   : > { %7583 = vmatmul.mubr.f32.vlgmr.msra.gmra.mrb[4].mxu0 %v10596_v10 }
 0x272   : > { %8535 = vmatpush3.bf16.msra.mxu1 %v10388_v56  ;;  %8970 = vmatpush3.bf16.msra.mxu0 %v10163_v12 }
 0x273   : > { %8536 = vmatprep.subr.bf16.mxu1 %v9874_v3  ;;  %8971 = vmatprep.subr.bf16.mxu0 %v9874_v3 }
 0x274   : > { %7617 = vmatprep.mubr.msk.f32.mxu0 %vm9875_vm0, %v9876_v8 }
 0x275   : > { %6953 = vmatmul.mubr.f32.vlgmr.msra.gmra.mrb[0].mxu1 %v10616_v54  ;;  %v1638_v54 = vstv %s1637_s26  ;;  %s5809_s26 = sld [smem:[#allocation2 + $0x3]] }
 0x276   : > { %8538 = vmatpush3.bf16.msra.mxu1 %v10163_v12  ;;  %8973 = vmatpush3.bf16.msra.mxu0 %v10166_v13 }
 0x277   : > { %8539 = vmatprep.subr.bf16.mxu1 %v9874_v3  ;;  %8974 = vmatprep.subr.bf16.mxu0 %v9874_v3 }
 0x278   : > { %6987 = vmatprep.mubr.msk.f32.mxu1 %vm9875_vm0, %v9876_v8 }
 0x27a   : > { %8541 = vmatpush3.bf16.msra.mxu1 %v10166_v13  ;;  %8976 = vmatpush3.bf16.msra.mxu0 %v10175_v20 }
 0x27b   : > { %8542 = vmatprep.subr.bf16.mxu1 %v9874_v3  ;;  %8977 = vmatprep.subr.bf16.mxu0 %v9874_v3 }
 0x27e   : > { %8544 = vmatpush3.bf16.msra.mxu1 %v10175_v20  ;;  %8979 = vmatpush3.bf16.msra.mxu0 %v10185_v31 }
 0x27f   : > { %8545 = vmatprep.subr.bf16.mxu1 %v9874_v3  ;;  %8980 = vmatprep.subr.bf16.mxu0 %v9874_v3 }
 0x282   : > { %8547 = vmatpush3.bf16.msra.mxu1 %v10185_v31  ;;  %8982 = vmatpush3.bf16.msra.mxu0 %v10199_v46 }
 0x283   : > { %8548 = vmatprep.subr.bf16.mxu1 %v9874_v3  ;;  %8983 = vmatprep.subr.bf16.mxu0 %v9874_v3 }
 0x286   : > { %8550 = vmatpush3.bf16.msra.mxu1 %v10199_v46  ;;  %8985 = vmatpush3.bf16.msra.mxu0 %v10213_v51 }
 0x287   : > { %8551 = vmatprep.subr.bf16.mxu1 %v9874_v3  ;;  %8986 = vmatprep.subr.bf16.mxu0 %v9874_v3 }
 0x28a   : > { %8553 = vmatpush3.bf16.msra.mxu1 %v10213_v51  ;;  %8988 = vmatpush3.bf16.msra.mxu0 %v10215_v52 }
 0x28b   : > { %8554 = vmatprep.subr.bf16.mxu1 %v9874_v3  ;;  %8989 = vmatprep.subr.bf16.mxu0 %v9874_v3 }
 0x28e   : > { %8556 = vmatpush3.bf16.msra.mxu1 %v10215_v52  ;;  %8991 = vmatpush3.bf16.msra.mxu0 %v10217_v53 }
 0x28f   : > { %8557 = vmatprep.subr.bf16.mxu1 %v9874_v3  ;;  %8992 = vmatprep.subr.bf16.mxu0 %v9874_v3 }
 0x291   : > { %7618 = vmatmul.mubr.f32.vlgmr.msra.gmra.mrb[4].mxu0 %v3079_v41 }
 0x292   : > { %8559 = vmatpush3.bf16.msra.mxu1 %v10217_v53  ;;  %8994 = vmatpush3.bf16.msra.mxu0 %v10272_v29 }
 0x293   : > { %8560 = vmatprep.subr.bf16.mxu1 %v9874_v3  ;;  %8995 = vmatprep.subr.bf16.mxu0 %v9874_v3 }
 0x294   : > { %7652 = vmatprep.mubr.msk.f32.mxu0 %vm9875_vm0, %v9876_v8 }
 0x295   : > { %6988 = vmatmul.mubr.f32.vlgmr.msra.gmra.mrb[0].mxu1 %v1078_v22 }
 0x296   : > { %8562 = vmatpush3.bf16.msra.mxu1 %v10272_v29  ;;  %8997 = vmatpush3.bf16.msra.mxu0 %v10274_v32 }
 0x297   : > { %8563 = vmatprep.subr.bf16.mxu1 %v9874_v3  ;;  %8998 = vmatprep.subr.bf16.mxu0 %v9874_v3 }
 0x298   : > { %7022 = vmatprep.mubr.msk.f32.mxu1 %vm9875_vm0, %v9876_v8 }
 0x29a   : > { %8565 = vmatpush3.bf16.msra.mxu1 %v10274_v32  ;;  %9000 = vmatpush3.bf16.msra.mxu0 %v10277_v33 }
 0x29b   : > { %8566 = vmatprep.subr.bf16.mxu1 %v9874_v3  ;;  %9001 = vmatprep.subr.bf16.mxu0 %v9874_v3 }
 0x29e   : > { %8568 = vmatpush3.bf16.msra.mxu1 %v10277_v33  ;;  %9003 = vmatpush3.bf16.msra.mxu0 %v10279_v34 }
 0x29f   : > { %8569 = vmatprep.subr.bf16.mxu1 %v9874_v3  ;;  %9004 = vmatprep.subr.bf16.mxu0 %v9874_v3 }
 0x2a2   : > { %8571 = vmatpush3.bf16.msra.mxu1 %v10279_v34  ;;  %9006 = vmatpush3.bf16.msra.mxu0 %v10281_v35 }
 0x2a3   : > { %8572 = vmatprep.subr.bf16.mxu1 %v9874_v3  ;;  %9007 = vmatprep.subr.bf16.mxu0 %v9874_v3 }
 0x2a6   : > { %8574 = vmatpush3.bf16.msra.mxu1 %v10281_v35  ;;  %9009 = vmatpush3.bf16.msra.mxu0 %v10283_v38 }
 0x2a7   : > { %8575 = vmatprep.subr.bf16.mxu1 %v9874_v3  ;;  %9010 = vmatprep.subr.bf16.mxu0 %v9874_v3 }
 0x2aa   : > { %8577 = vmatpush3.bf16.msra.mxu1 %v10283_v38  ;;  %9012 = vmatpush3.bf16.msra.mxu0 %v10286_v39 }
 0x2ab   : > { %8578 = vmatprep.subr.bf16.mxu1 %v9874_v3  ;;  %9013 = vmatprep.subr.bf16.mxu0 %v9874_v3 }
 0x2ae   : > { %8580 = vmatpush3.bf16.msra.mxu1 %v10286_v39  ;;  %9015 = vmatpush3.bf16.msra.mxu0 %v10288_v40 }
 0x2af   : > { %8581 = vmatprep.subr.bf16.mxu1 %v9874_v3  ;;  %9016 = vmatprep.subr.bf16.mxu0 %v9874_v3 }
 0x2b1   : > { %7653 = vmatmul.mubr.f32.vlgmr.msra.gmra.mrb[4].mxu0 %v10590_v9 }
 0x2b2   : > { %8583 = vmatpush3.bf16.msra.mxu1 %v10288_v40  ;;  %9018 = vmatpush3.bf16.msra.mxu0 %v10163_v12 }
 0x2b3   : > { %8584 = vmatprep.subr.bf16.mxu1 %v9874_v3  ;;  %9019 = vmatprep.subr.bf16.mxu0 %v9874_v3 }
 0x2b4   : > { %7687 = vmatprep.mubr.msk.f32.mxu0 %vm9875_vm0, %v9876_v8 }
 0x2b5   : > { %7023 = vmatmul.mubr.f32.vlgmr.msra.gmra.mrb[0].mxu1 %v10612_v21 }
 0x2b6   : > { %8586 = vmatpush3.bf16.msra.mxu1 %v10163_v12  ;;  %9021 = vmatpush3.bf16.msra.mxu0 %v10166_v13 }
 0x2b7   : > { %8587 = vmatprep.subr.bf16.mxu1 %v9874_v3  ;;  %9022 = vmatprep.subr.bf16.mxu0 %v9874_v3 }
 0x2b8   : > { %7057 = vmatprep.mubr.msk.f32.mxu1 %vm9875_vm0, %v9876_v8 }
 0x2ba   : > { %8589 = vmatpush3.bf16.msra.mxu1 %v10166_v13  ;;  %9024 = vmatpush3.bf16.msra.mxu0 %v10175_v20 }
 0x2bb   : > { %8590 = vmatprep.subr.bf16.mxu1 %v9874_v3  ;;  %9025 = vmatprep.subr.bf16.mxu0 %v9874_v3 }
 0x2be   : > { %8592 = vmatpush3.bf16.msra.mxu1 %v10175_v20  ;;  %9027 = vmatpush3.bf16.msra.mxu0 %v10185_v31 }
 0x2bf   : > { %8593 = vmatprep.subr.bf16.mxu1 %v9874_v3  ;;  %9028 = vmatprep.subr.bf16.mxu0 %v9874_v3 }
 0x2c2   : > { %8595 = vmatpush3.bf16.msra.mxu1 %v10185_v31  ;;  %9030 = vmatpush3.bf16.msra.mxu0 %v10199_v46 }
 0x2c3   : > { %8596 = vmatprep.subr.bf16.mxu1 %v9874_v3  ;;  %9031 = vmatprep.subr.bf16.mxu0 %v9874_v3 }
 0x2c6   : > { %8598 = vmatpush3.bf16.msra.mxu1 %v10199_v46  ;;  %9033 = vmatpush3.bf16.msra.mxu0 %v10213_v51 }
 0x2c7   : > { %8599 = vmatprep.subr.bf16.mxu1 %v9874_v3  ;;  %9034 = vmatprep.subr.bf16.mxu0 %v9874_v3 }
 0x2ca   : > { %8601 = vmatpush3.bf16.msra.mxu1 %v10213_v51  ;;  %9036 = vmatpush3.bf16.msra.mxu0 %v10215_v52 }
 0x2cb   : > { %8602 = vmatprep.subr.bf16.mxu1 %v9874_v3  ;;  %9037 = vmatprep.subr.bf16.mxu0 %v9874_v3 }
 0x2ce   : > { %8604 = vmatpush3.bf16.msra.mxu1 %v10215_v52  ;;  %9039 = vmatpush3.bf16.msra.mxu0 %v10217_v53 }
 0x2cf   : > { %8605 = vmatprep.subr.bf16.mxu1 %v9874_v3  ;;  %9184 = vmatprep.subr.bf16.mxu0 %v9874_v3 }
 0x2d1   : > { %7688 = vmatmul.mubr.f32.vlgmr.msra.gmra.mrb[4].mxu0 %v10590_v9  ;;  %v4400_v9 = vand.u32 4294901760, %v4399_v2 }
 0x2d2   : > { %8607 = vmatpush3.bf16.msra.mxu1 %v10217_v53  ;;  %9186 = vmatpush3.bf16.msra.mxu0 %v10163_v12 }
 0x2d3   : > { %8752 = vmatprep.subr.bf16.mxu1 %v9874_v3  ;;  %9187 = vmatprep.subr.bf16.mxu0 %v9874_v3 }
 0x2d4   : > { %7932 = vmatprep.mubr.msk.f32.mxu0 %vm9875_vm0, %v9876_v8 }
 0x2d5   : > { %7058 = vmatmul.mubr.f32.vlgmr.msra.gmra.mrb[0].mxu1 %v10612_v21 }
 0x2d6   : > { %8754 = vmatpush3.bf16.msra.mxu1 %v10163_v12  ;;  %9189 = vmatpush3.bf16.msra.mxu0 %v10166_v13 }
 0x2d7   : > { %8755 = vmatprep.subr.bf16.mxu1 %v9874_v3  ;;  %9190 = vmatprep.subr.bf16.mxu0 %v9874_v3 }
 0x2d8   : > { %7302 = vmatprep.mubr.msk.f32.mxu1 %vm9875_vm0, %v9876_v8 }
 0x2da   : > { %8757 = vmatpush3.bf16.msra.mxu1 %v10166_v13  ;;  %9192 = vmatpush3.bf16.msra.mxu0 %v10175_v20 }
 0x2db   : > { %8758 = vmatprep.subr.bf16.mxu1 %v9874_v3  ;;  %9193 = vmatprep.subr.bf16.mxu0 %v9874_v3 }
 0x2de   : > { %8760 = vmatpush3.bf16.msra.mxu1 %v10175_v20  ;;  %9195 = vmatpush3.bf16.msra.mxu0 %v10185_v31 }
 0x2df   : > { %8761 = vmatprep.subr.bf16.mxu1 %v9874_v3  ;;  %9196 = vmatprep.subr.bf16.mxu0 %v9874_v3 }
 0x2e2   : > { %8763 = vmatpush3.bf16.msra.mxu1 %v10185_v31  ;;  %9198 = vmatpush3.bf16.msra.mxu0 %v10199_v46 }
 0x2e3   : > { %8764 = vmatprep.subr.bf16.mxu1 %v9874_v3  ;;  %9199 = vmatprep.subr.bf16.mxu0 %v9874_v3 }
 0x2e4   : > { %v2314_v60 = vpop.f32.mrb[2].mxu0 }
 0x2e5   : > { %v2318_v37 = vmul.f32 0.0625, %v2314_v60  ;;  %v7269_v62 = vpop.f32.mrb[3].mxu0 }
 0x2e6   : > { %8766 = vmatpush3.bf16.msra.mxu1 %v10199_v46  ;;  %9201 = vmatpush3.bf16.msra.mxu0 %v10213_v51 }
 0x2e7   : > { %v10853_v0 = vsub.f32 %v10460_v61, %v2318_v37  ;;  %8767 = vmatprep.subr.bf16.mxu1 %v9874_v3  ;;  %9202 = vmatprep.subr.bf16.mxu0 %v9874_v3  ;;  %v1642_v37 = vstv %s11078_s17  ;;  %s5804_s17 = sld [smem:[#allocation2 + $0x102]] }
 0x2e9   : > { %v2320_v1 = vmul.f32 %v10853_v0, %v10853_v0 }
 0x2ea   : > { %8769 = vmatpush3.bf16.msra.mxu1 %v10213_v51  ;;  %9204 = vmatpush3.bf16.msra.mxu0 %v10215_v52 }
 0x2eb   : > { %v10864_v4 = vand.u32 4294901760, %v2320_v1  ;;  %8770 = vmatprep.subr.bf16.mxu1 %v9874_v3  ;;  %9205 = vmatprep.subr.bf16.mxu0 %v9874_v3 }
 0x2ed   : > { %v10869_v61 = vsub.f32 %v2320_v1, %v10864_v4  ;;  %v11117_v1 = vld [vmem:[%s11425_s1] ss:$0 sm:$0xff] }
 0x2ee   : > { %8772 = vmatpush3.bf16.msra.mxu1 %v10215_v52  ;;  %9207 = vmatpush3.bf16.msra.mxu0 %v10217_v53 }
 0x2ef   : > { %8773 = vmatprep.subr.bf16.mxu1 %v9874_v3  ;;  %9208 = vmatprep.subr.bf16.mxu0 %v9874_v3  ;;  %v2404_v10 = vand.u32 4294901760, %v10869_v61 }
 0x2f1   : > { %7933 = vmatmul.mubr.f32.vlgmr.msra.gmra.mrb[6].mxu0 %v4400_v9  ;;  %v2405_v15 = vsub.f32 %v10869_v61, %v2404_v10 }
 0x2f2   : > { %8775 = vmatpush3.bf16.msra.mxu1 %v10217_v53  ;;  %9210 = vmatpush3.bf16.msra.mxu0 %v10294_v43 }
 0x2f3   : > { %8776 = vmatprep.subr.bf16.mxu1 %v9874_v3  ;;  %v2406_v16 = vand.u32 4294901760, %v2405_v15  ;;  %9211 = vmatprep.subr.bf16.mxu0 %v9874_v3  ;;  %v1658_v15 = vstv %s5790_s12  ;;  %s5601_s12 = smul.f32 %s5809_s26, %s5809_s26 }
 0x2f4   : > { %7967 = vmatprep.mubr.msk.f32.mxu0 %vm9875_vm0, %v9876_v8 }
 0x2f5   : > { %7303 = vmatmul.mubr.f32.vlgmr.msra.gmra.mrb[2].mxu1 %v2406_v16  ;;  %v1660_v16 = vstv %s5791_s3  ;;  %s5823_s3 = sshll.u32 %s9856_s21, 7  ;;  %s9877_s21 = smov [#allocation10]  }
 0x2f6   : > { %8778 = vmatpush3.bf16.msra.mxu1 %v10294_v43  ;;  %9213 = vmatpush3.bf16.msra.mxu0 %v10302_v57 }
 0x2f7   : > { %8779 = vmatprep.subr.bf16.mxu1 %v9874_v3  ;;  %9214 = vmatprep.subr.bf16.mxu0 %v9874_v3 }
 0x2f8   : > { %7337 = vmatprep.mubr.msk.f32.mxu1 %vm9875_vm0, %v9876_v8 }
 0x2fa   : > { %8781 = vmatpush3.bf16.msra.mxu1 %v10302_v57  ;;  %9216 = vmatpush3.bf16.msra.mxu0 %v10309_v11 }
 0x2fb   : > { %8782 = vmatprep.subr.bf16.mxu1 %v9874_v3  ;;  %9217 = vmatprep.subr.bf16.mxu0 %v9874_v3 }
 0x2fe   : > { %8784 = vmatpush3.bf16.msra.mxu1 %v10309_v11  ;;  %9219 = vmatpush3.bf16.msra.mxu0 %v10316_v18 }
 0x2ff   : > { %8785 = vmatprep.subr.bf16.mxu1 %v9874_v3  ;;  %9220 = vmatprep.subr.bf16.mxu0 %v9874_v3 }
 0x302   : > { %8787 = vmatpush3.bf16.msra.mxu1 %v10316_v18  ;;  %9222 = vmatpush3.bf16.msra.mxu0 %v10322_v19 }
 0x303   : > { %8788 = vmatprep.subr.bf16.mxu1 %v9874_v3  ;;  %9223 = vmatprep.subr.bf16.mxu0 %v9874_v3 }
 0x306   : > { %8790 = vmatpush3.bf16.msra.mxu1 %v10322_v19  ;;  %9225 = vmatpush3.bf16.msra.mxu0 %v10328_v58 }
 0x307   : > { %8791 = vmatprep.subr.bf16.mxu1 %v9874_v3  ;;  %9226 = vmatprep.subr.bf16.mxu0 %v9874_v3 }
 0x30a   : > { %8793 = vmatpush3.bf16.msra.mxu1 %v10328_v58  ;;  %9228 = vmatpush3.bf16.msra.mxu0 %v10333_v6 }
 0x30b   : > { %8794 = vmatprep.subr.bf16.mxu1 %v9874_v3  ;;  %9229 = vmatprep.subr.bf16.mxu0 %v9874_v3 }
 0x30e   : > { %8796 = vmatpush3.bf16.msra.mxu1 %v10333_v6  ;;  %9231 = vmatpush3.bf16.msra.mxu0 %v10337_v27 }
 0x30f   : > { %8797 = vmatprep.subr.bf16.mxu1 %v9874_v3  ;;  %9232 = vmatprep.subr.bf16.mxu0 %v9874_v3 }
 0x311   : > { %7968 = vmatmul.mubr.f32.vlgmr.msra.gmra.mrb[6].mxu0 %v10835_v26 }
 0x312   : > { %8799 = vmatpush3.bf16.msra.mxu1 %v10337_v27  ;;  %9234 = vmatpush3.bf16.msra.mxu0 %v10343_v28 }
 0x313   : > { %8800 = vmatprep.subr.bf16.mxu1 %v9874_v3  ;;  %9235 = vmatprep.subr.bf16.mxu0 %v9874_v3 }
 0x314   : > { %8002 = vmatprep.mubr.msk.f32.mxu0 %vm9875_vm0, %v9876_v8 }
 0x315   : > { %7338 = vmatmul.mubr.f32.vlgmr.msra.gmra.mrb[2].mxu1 %v10864_v4 }
 0x316   : > { %8802 = vmatpush3.bf16.msra.mxu1 %v10343_v28  ;;  %9237 = vmatpush3.bf16.msra.mxu0 %v10350_v14 }
 0x317   : > { %8803 = vmatprep.subr.bf16.mxu1 %v9874_v3  ;;  %9238 = vmatprep.subr.bf16.mxu0 %v9874_v3 }
 0x318   : > { %7372 = vmatprep.mubr.msk.f32.mxu1 %vm9875_vm0, %v9876_v8 }
 0x31a   : > { %8805 = vmatpush3.bf16.msra.mxu1 %v10350_v14  ;;  %9240 = vmatpush3.bf16.msra.mxu0 %v10358_v30 }
 0x31b   : > { %8806 = vmatprep.subr.bf16.mxu1 %v9874_v3  ;;  %9241 = vmatprep.subr.bf16.mxu0 %v9874_v3 }
 0x31e   : > { %8808 = vmatpush3.bf16.msra.mxu1 %v10358_v30  ;;  %9243 = vmatpush3.bf16.msra.mxu0 %v10364_v36 }
 0x31f   : > { %8809 = vmatprep.subr.bf16.mxu1 %v9874_v3  ;;  %9244 = vmatprep.subr.bf16.mxu0 %v9874_v3 }
 0x322   : > { %8811 = vmatpush3.bf16.msra.mxu1 %v10364_v36  ;;  %9246 = vmatpush3.bf16.msra.mxu0 %v10370_v45 }
 0x323   : > { %8812 = vmatprep.subr.bf16.mxu1 %v9874_v3  ;;  %9247 = vmatprep.subr.bf16.mxu0 %v9874_v3 }
 0x326   : > { %8814 = vmatpush3.bf16.msra.mxu1 %v10370_v45  ;;  %9249 = vmatpush3.bf16.msra.mxu0 %v10376_v48 }
 0x327   : > { %8815 = vmatprep.subr.bf16.mxu1 %v9874_v3  ;;  %9250 = vmatprep.subr.bf16.mxu0 %v9874_v3 }
 0x32a   : > { %8817 = vmatpush3.bf16.msra.mxu1 %v10376_v48  ;;  %9252 = vmatpush3.bf16.msra.mxu0 %v10382_v49 }
 0x32b   : > { %8818 = vmatprep.subr.bf16.mxu1 %v9874_v3  ;;  %9253 = vmatprep.subr.bf16.mxu0 %v9874_v3 }
 0x32e   : > { %8820 = vmatpush3.bf16.msra.mxu1 %v10382_v49  ;;  %9255 = vmatpush3.bf16.msra.mxu0 %v10388_v56 }
 0x32f   : > { %8821 = vmatprep.subr.bf16.mxu1 %v9874_v3  ;;  %9256 = vmatprep.subr.bf16.mxu0 %v9874_v3 }
 0x331   : > { %8003 = vmatmul.mubr.f32.vlgmr.msra.gmra.mrb[6].mxu0 %v10843_v50 }
 0x332   : > { %8823 = vmatpush3.bf16.msra.mxu1 %v10388_v56  ;;  %9258 = vmatpush3.bf16.msra.mxu0 %v10163_v12 }
 0x333   : > { %8824 = vmatprep.subr.bf16.mxu1 %v9874_v3  ;;  %9259 = vmatprep.subr.bf16.mxu0 %v9874_v3 }
 0x334   : > { %8037 = vmatprep.mubr.msk.f32.mxu0 %vm9875_vm0, %v9876_v8 }
 0x335   : > { %7373 = vmatmul.mubr.f32.vlgmr.msra.gmra.mrb[2].mxu1 %v10869_v61 }
 0x336   : > { %8826 = vmatpush3.bf16.msra.mxu1 %v10163_v12  ;;  %9261 = vmatpush3.bf16.msra.mxu0 %v10166_v13 }
 0x337   : > { %8827 = vmatprep.subr.bf16.mxu1 %v9874_v3  ;;  %9262 = vmatprep.subr.bf16.mxu0 %v9874_v3 }
 0x338   : > { %7407 = vmatprep.mubr.msk.f32.mxu1 %vm9875_vm0, %v9876_v8 }
 0x33a   : > { %8829 = vmatpush3.bf16.msra.mxu1 %v10166_v13  ;;  %9264 = vmatpush3.bf16.msra.mxu0 %v10175_v20 }
 0x33b   : > { %8830 = vmatprep.subr.bf16.mxu1 %v9874_v3  ;;  %9265 = vmatprep.subr.bf16.mxu0 %v9874_v3 }
 0x33e   : > { %8832 = vmatpush3.bf16.msra.mxu1 %v10175_v20  ;;  %9267 = vmatpush3.bf16.msra.mxu0 %v10185_v31 }
 0x33f   : > { %8833 = vmatprep.subr.bf16.mxu1 %v9874_v3  ;;  %9268 = vmatprep.subr.bf16.mxu0 %v9874_v3 }
 0x342   : > { %8835 = vmatpush3.bf16.msra.mxu1 %v10185_v31  ;;  %9270 = vmatpush3.bf16.msra.mxu0 %v10199_v46 }
 0x343   : > { %8836 = vmatprep.subr.bf16.mxu1 %v9874_v3  ;;  %9271 = vmatprep.subr.bf16.mxu0 %v9874_v3 }
 0x346   : > { %8838 = vmatpush3.bf16.msra.mxu1 %v10199_v46  ;;  %9273 = vmatpush3.bf16.msra.mxu0 %v10213_v51 }
 0x347   : > { %8839 = vmatprep.subr.bf16.mxu1 %v9874_v3  ;;  %9274 = vmatprep.subr.bf16.mxu0 %v9874_v3 }
 0x34a   : > { %8841 = vmatpush3.bf16.msra.mxu1 %v10213_v51  ;;  %9276 = vmatpush3.bf16.msra.mxu0 %v10215_v52 }
 0x34b   : > { %8842 = vmatprep.subr.bf16.mxu1 %v9874_v3  ;;  %9277 = vmatprep.subr.bf16.mxu0 %v9874_v3 }
 0x34e   : > { %8844 = vmatpush3.bf16.msra.mxu1 %v10215_v52  ;;  %9279 = vmatpush3.bf16.msra.mxu0 %v10217_v53 }
 0x34f   : > { %8845 = vmatprep.subr.bf16.mxu1 %v9874_v3  ;;  %9280 = vmatprep.subr.bf16.mxu0 %v9874_v3 }
 0x351   : > { %8038 = vmatmul.mubr.f32.vlgmr.msra.gmra.mrb[6].mxu0 %v4398_v63 }
 0x352   : > { %8847 = vmatpush3.bf16.msra.mxu1 %v10217_v53  ;;  %9282 = vmatpush3.bf16.msra.mxu0 %v10272_v29 }
 0x353   : > { %8848 = vmatprep.subr.bf16.mxu1 %v9874_v3  ;;  %9283 = vmatprep.subr.bf16.mxu0 %v9874_v3 }
 0x354   : > { %8072 = vmatprep.mubr.msk.f32.mxu0 %vm9875_vm0, %v9876_v8 }
 0x355   : > { %7408 = vmatmul.mubr.f32.vlgmr.msra.gmra.mrb[2].mxu1 %v2404_v10 }
 0x356   : > { %8850 = vmatpush3.bf16.msra.mxu1 %v10272_v29  ;;  %9285 = vmatpush3.bf16.msra.mxu0 %v10274_v32 }
 0x357   : > { %8851 = vmatprep.subr.bf16.mxu1 %v9874_v3  ;;  %9286 = vmatprep.subr.bf16.mxu0 %v9874_v3 }
 0x358   : > { %7442 = vmatprep.mubr.msk.f32.mxu1 %vm9875_vm0, %v9876_v8 }
 0x35a   : > { %8853 = vmatpush3.bf16.msra.mxu1 %v10274_v32  ;;  %9288 = vmatpush3.bf16.msra.mxu0 %v10277_v33 }
 0x35b   : > { %8854 = vmatprep.subr.bf16.mxu1 %v9874_v3  ;;  %9289 = vmatprep.subr.bf16.mxu0 %v9874_v3 }
 0x35e   : > { %8856 = vmatpush3.bf16.msra.mxu1 %v10277_v33  ;;  %9291 = vmatpush3.bf16.msra.mxu0 %v10279_v34 }
 0x35f   : > { %8857 = vmatprep.subr.bf16.mxu1 %v9874_v3  ;;  %9292 = vmatprep.subr.bf16.mxu0 %v9874_v3 }
 0x362   : > { %8859 = vmatpush3.bf16.msra.mxu1 %v10279_v34  ;;  %9294 = vmatpush3.bf16.msra.mxu0 %v10281_v35 }
 0x363   : > { %8860 = vmatprep.subr.bf16.mxu1 %v9874_v3  ;;  %9295 = vmatprep.subr.bf16.mxu0 %v9874_v3 }
 0x366   : > { %8862 = vmatpush3.bf16.msra.mxu1 %v10281_v35  ;;  %9297 = vmatpush3.bf16.msra.mxu0 %v10283_v38 }
 0x367   : > { %8863 = vmatprep.subr.bf16.mxu1 %v9874_v3  ;;  %9298 = vmatprep.subr.bf16.mxu0 %v9874_v3 }
 0x36a   : > { %8865 = vmatpush3.bf16.msra.mxu1 %v10283_v38  ;;  %9300 = vmatpush3.bf16.msra.mxu0 %v10286_v39 }
 0x36b   : > { %8866 = vmatprep.subr.bf16.mxu1 %v9874_v3  ;;  %9301 = vmatprep.subr.bf16.mxu0 %v9874_v3 }
 0x36e   : > { %8868 = vmatpush3.bf16.msra.mxu1 %v10286_v39  ;;  %9303 = vmatpush3.bf16.msra.mxu0 %v10288_v40 }
 0x36f   : > { %8869 = vmatprep.subr.bf16.mxu1 %v9874_v3  ;;  %9304 = vmatprep.subr.bf16.mxu0 %v9874_v3 }
 0x371   : > { %8073 = vmatmul.mubr.f32.vlgmr.msra.gmra.mrb[6].mxu0 %v10835_v26 }
 0x372   : > { %8871 = vmatpush3.bf16.msra.mxu1 %v10288_v40  ;;  %9306 = vmatpush3.bf16.msra.mxu0 %v10163_v12 }
 0x373   : > { %8872 = vmatprep.subr.bf16.mxu1 %v9874_v3  ;;  %9307 = vmatprep.subr.bf16.mxu0 %v9874_v3 }
 0x374   : > { %8107 = vmatprep.mubr.msk.f32.mxu0 %vm9875_vm0, %v9876_v8 }
 0x375   : > { %7443 = vmatmul.mubr.f32.vlgmr.msra.gmra.mrb[2].mxu1 %v10864_v4 }
 0x376   : > { %8874 = vmatpush3.bf16.msra.mxu1 %v10163_v12  ;;  %9309 = vmatpush3.bf16.msra.mxu0 %v10166_v13 }
 0x377   : > { %8875 = vmatprep.subr.bf16.mxu1 %v9874_v3  ;;  %9310 = vmatprep.subr.bf16.mxu0 %v9874_v3 }
 0x378   : > { %7477 = vmatprep.mubr.msk.f32.mxu1 %vm9875_vm0, %v9876_v8 }
 0x37a   : > { %8877 = vmatpush3.bf16.msra.mxu1 %v10166_v13  ;;  %9312 = vmatpush3.bf16.msra.mxu0 %v10175_v20 }
 0x37b   : > { %8878 = vmatprep.subr.bf16.mxu1 %v9874_v3  ;;  %9313 = vmatprep.subr.bf16.mxu0 %v9874_v3 }
 0x37e   : > { %8880 = vmatpush3.bf16.msra.mxu1 %v10175_v20  ;;  %9315 = vmatpush3.bf16.msra.mxu0 %v10185_v31 }
 0x37f   : > { %8881 = vmatprep.subr.bf16.mxu1 %v9874_v3  ;;  %9316 = vmatprep.subr.bf16.mxu0 %v9874_v3 }
 0x382   : > { %8883 = vmatpush3.bf16.msra.mxu1 %v10185_v31  ;;  %9318 = vmatpush3.bf16.msra.mxu0 %v10199_v46 }
 0x383   : > { %8884 = vmatprep.subr.bf16.mxu1 %v9874_v3  ;;  %9319 = vmatprep.subr.bf16.mxu0 %v9874_v3 }
 0x386   : > { %8886 = vmatpush3.bf16.msra.mxu1 %v10199_v46  ;;  %9321 = vmatpush3.bf16.msra.mxu0 %v10213_v51 }
 0x387   : > { %8887 = vmatprep.subr.bf16.mxu1 %v9874_v3  ;;  %9322 = vmatprep.subr.bf16.mxu0 %v9874_v3 }
 0x38a   : > { %8889 = vmatpush3.bf16.msra.mxu1 %v10213_v51  ;;  %9324 = vmatpush3.bf16.msra.mxu0 %v10215_v52 }
 0x38b   : > { %8890 = vmatprep.subr.bf16.mxu1 %v9874_v3  ;;  %9325 = vmatprep.subr.bf16.mxu0 %v9874_v3 }
 0x38e   : > { %8892 = vmatpush3.bf16.msra.mxu1 %v10215_v52  ;;  %9327 = vmatpush3.bf16.msra.mxu0 %v10217_v53 }
 0x38f   : > { %8893 = vmatprep.subr.bf16.mxu1 %v9874_v3 }
 0x391   : > { %8108 = vmatmul.mubr.f32.vlgmr.msra.gmra.mrb[6].mxu0 %v10835_v26 }
 0x392   : > { %8895 = vmatpush3.bf16.msra.mxu1 %v10217_v53 }
 0x393   : > { %9040 = vmatprep.subr.bf16.mxu1 %v9874_v3 }
 0x395   : > { %7478 = vmatmul.mubr.f32.vlgmr.msra.gmra.mrb[2].mxu1 %v10864_v4  ;;  %v11124_v4 = vld [vmem:[%s11425_s1 + $0x1] ss:$0 sm:$0xff] }
 0x396   : > { %9042 = vmatpush3.bf16.msra.mxu1 %v10163_v12  ;;  %7722 = vmatprep.mubr.msk.f32.mxu1 %vm9875_vm0, %v9876_v8 }
 0x397   : > { %9043 = vmatprep.subr.bf16.mxu1 %v9874_v3 }
 0x39a   : > { %9045 = vmatpush3.bf16.msra.mxu1 %v10166_v13 }
 0x39b   : > { %9046 = vmatprep.subr.bf16.mxu1 %v9874_v3 }
 0x39e   : > { %9048 = vmatpush3.bf16.msra.mxu1 %v10175_v20 }
 0x39f   : > { %9049 = vmatprep.subr.bf16.mxu1 %v9874_v3 }
 0x3a2   : > { %9051 = vmatpush3.bf16.msra.mxu1 %v10185_v31 }
 0x3a3   : > { %9052 = vmatprep.subr.bf16.mxu1 %v9874_v3 }
 0x3a4   : > { %v3633_v17 = vpop.f32.mrb[4].mxu0 }
 0x3a5   : > { %v3637_v41 = vmul.f32 0.0625, %v3633_v17  ;;  %v7689_v44 = vpop.f32.mrb[5].mxu0 }
 0x3a6   : > { %9054 = vmatpush3.bf16.msra.mxu1 %v10199_v46 }
 0x3a7   : > { %v11088_v47 = vsub.f32 %v10585_v5, %v3637_v41  ;;  %9055 = vmatprep.subr.bf16.mxu1 %v9874_v3 }
 0x3a8   : > { %v1632_v21 = vpop.f32.mrb[0].mxu1 }
 0x3a9   : > { %v3639_v25 = vmul.f32 %v11088_v47, %v11088_v47  ;;  %v1636_v22 = vmul.f32 0.0625, %v1632_v21  ;;  %v7059_v55 = vpop.f32.mrb[1].mxu1 }
 0x3aa   : > { %9057 = vmatpush3.bf16.msra.mxu1 %v10213_v51 }
 0x3ab   : > { %v11094_v23 = vand.u32 4294901760, %v3639_v25  ;;  %v1639_v59 = vmul.f32 %v1638_v54, %v1636_v22  ;;  %9058 = vmatprep.subr.bf16.mxu1 %v9874_v3 }
 0x3ad   : > { %v11098_v5 = vsub.f32 %v3639_v25, %v11094_v23  ;;  %v1640_v24 = vadd.f32 4.0, %v1639_v59 }
 0x3ae   : > { %9060 = vmatpush3.bf16.msra.mxu1 %v10215_v52 }
 0x3af   : > { %9649 = vrsqrt.f32 %v1640_v24  ;;  %9061 = vmatprep.subr.bf16.mxu1 %v9874_v3  ;;  %v3723_v26 = vand.u32 4294901760, %v11098_v5  ;;  %v2964_v24 = vstv %s2963_s28  ;;  %s11370_s28 = scalar_lea.hbm %s11429_s5, %s5823_s3 }
 0x3b1   : > { %v3724_v50 = vsub.f32 %v11098_v5, %v3723_v26 }
 0x3b2   : > { %9063 = vmatpush3.bf16.msra.mxu1 %v10217_v53 }
 0x3b3   : > { %9064 = vmatprep.subr.bf16.mxu1 %v9874_v3  ;;  %v3725_v60 = vand.u32 4294901760, %v3724_v50 }
 0x3b5   : > { %7723 = vmatmul.mubr.f32.vlgmr.msra.gmra.mrb[4].mxu1 %v3725_v60 }
 0x3b6   : > { %9066 = vmatpush3.bf16.msra.mxu1 %v10294_v43  ;;  %7757 = vmatprep.mubr.msk.f32.mxu1 %vm9875_vm0, %v9876_v8 }
 0x3b7   : > { %9067 = vmatprep.subr.bf16.mxu1 %v9874_v3 }
 0x3b9   : > { %v9650_v62 = vpop.eup %9649 }
 0x3ba   : > { %v1643_v63 = vmul.f32 %v9650_v62, %v1642_v37  ;;  %9069 = vmatpush3.bf16.msra.mxu1 %v10302_v57 }
 0x3bb   : > { %9070 = vmatprep.subr.bf16.mxu1 %v9874_v3 }
 0x3bc   : > { %v1644_v2 = vmul.f32 %v1643_v63, %v10603_v42 }
 0x3be   : > { %v1649_v61 = vmul.f32 %v11117_v1, %v1644_v2  ;;  %9072 = vmatpush3.bf16.msra.mxu1 %v10309_v11 }
 0x3bf   : > { %9073 = vmatprep.subr.bf16.mxu1 %v9874_v3 }
 0x3c0   : > { %v1654_v9 = vadd.f32 %v11124_v4, %v1649_v61 }
 0x3c2   : > { %vm1655_vm1 = vcmp.gt.f32.partialorder %v1654_v9, 0.0  ;;  %v1656_v10 = vmul.f32 0.25, %v1654_v9  ;;  %9075 = vmatpush3.bf16.msra.mxu1 %v10316_v18 }
 0x3c3   : > { %9076 = vmatprep.subr.bf16.mxu1 %v9874_v3 }
 0x3c4   : > { %v1657_v42 = vsel %vm1655_vm1, %v1654_v9, %v1656_v10  ;;  %v2968_v10 = vstv %s11228_s16 }
 0x3c5   : > { %v1659_v17 = vmul.f32 %v1658_v15, %v1657_v42 }
 0x3c6   : > { %9078 = vmatpush3.bf16.msra.mxu1 %v10322_v19 }
 0x3c7   : > { %v1661_v41 = vadd.f32 %v1660_v16, %v1659_v17  ;;  %9079 = vmatprep.subr.bf16.mxu1 %v9874_v3 }
 0x3c9   : > { %v5794_v44 = vmul.f32 -1.442695, %v1661_v41 }
 0x3ca   : > { %9081 = vmatpush3.bf16.msra.mxu1 %v10328_v58 }
 0x3cb   : > { %9651 = vpow2.f32 %v5794_v44  ;;  %9082 = vmatprep.subr.bf16.mxu1 %v9874_v3  ;;  %v2976_v44 = vstv %s5796_s15  ;;  %s11377_s15 = scalar_lea.sflag [#allocation4], %s283_s29 }
 0x3ce   : > { %9084 = vmatpush3.bf16.msra.mxu1 %v10333_v6 }
 0x3cf   : > { %9085 = vmatprep.subr.bf16.mxu1 %v9874_v3 }
 0x3d2   : > { %9087 = vmatpush3.bf16.msra.mxu1 %v10337_v27 }
 0x3d3   : > { %9088 = vmatprep.subr.bf16.mxu1 %v9874_v3 }
 0x3d5   : > { %v9652_v21 = vpop.eup %9651  ;;  %7758 = vmatmul.mubr.f32.vlgmr.msra.gmra.mrb[4].mxu1 %v11094_v23 }
 0x3d6   : > { %9090 = vmatpush3.bf16.msra.mxu1 %v10343_v28  ;;  %7792 = vmatprep.mubr.msk.f32.mxu1 %vm9875_vm0, %v9876_v8  ;;  %v1665_v54 = vadd.f32 1.0, %v9652_v21  ;;  %v2978_v21 = vstv %s5797_s7  ;;  %s9774_s7 = scalar_lea.vmem %s11372_s10, 128 }
 0x3d7   : > { %9091 = vmatprep.subr.bf16.mxu1 %v9874_v3  ;;  %p9775_p5 = scmp.ne.s32.totalorder %s11372_s10, %s9774_s7 }
 0x3d8   : > { %9653 = vrcp.f32 %v1665_v54 }
 0x3d9   : > { %p9776_p10 = pnand %p9775_p5, %p11454_p12 }
 0x3da   : > { %9093 = vmatpush3.bf16.msra.mxu1 %v10350_v14 }
 0x3db   : > { %9094 = vmatprep.subr.bf16.mxu1 %v9874_v3  ;;  %p9777_p9 = pneg %p9776_p10 }
 0x3de   : > { %9096 = vmatpush3.bf16.msra.mxu1 %v10358_v30 }
 0x3df   : > { %9097 = vmatprep.subr.bf16.mxu1 %v9874_v3 }
 0x3e2   : > { %v9654_v25 = vpop.eup %9653  ;;  %9099 = vmatpush3.bf16.msra.mxu1 %v10364_v36 }
 0x3e3   : > { %9100 = vmatprep.subr.bf16.mxu1 %v9874_v3  ;;  %1668 = vst [vmem:[%s11152_s13] sm:$0x3] %v9654_v25 }
 0x3e6   : > { %9102 = vmatpush3.bf16.msra.mxu1 %v10370_v45 }
 0x3e7   : > { %9103 = vmatprep.subr.bf16.mxu1 %v9874_v3 }
 0x3ea   : > { %9105 = vmatpush3.bf16.msra.mxu1 %v10376_v48 }
 0x3eb   : > { %9106 = vmatprep.subr.bf16.mxu1 %v9874_v3 }
 0x3ee   : > { %9108 = vmatpush3.bf16.msra.mxu1 %v10382_v49 }
 0x3ef   : > { %9109 = vmatprep.subr.bf16.mxu1 %v9874_v3 }
 0x3f2   : > { %9111 = vmatpush3.bf16.msra.mxu1 %v10388_v56 }
 0x3f3   : > { %9112 = vmatprep.subr.bf16.mxu1 %v9874_v3 }
 0x3f5   : > { %7793 = vmatmul.mubr.f32.vlgmr.msra.gmra.mrb[4].mxu1 %v11098_v5 }
 0x3f6   : > { %9114 = vmatpush3.bf16.msra.mxu1 %v10163_v12  ;;  %7827 = vmatprep.mubr.msk.f32.mxu1 %vm9875_vm0, %v9876_v8 }
 0x3f7   : > { %9115 = vmatprep.subr.bf16.mxu1 %v9874_v3 }
 0x3fa   : > { %9117 = vmatpush3.bf16.msra.mxu1 %v10166_v13 }
 0x3fb   : > { %9118 = vmatprep.subr.bf16.mxu1 %v9874_v3 }
 0x3fe   : > { %9120 = vmatpush3.bf16.msra.mxu1 %v10175_v20 }
 0x3ff   : > { %9121 = vmatprep.subr.bf16.mxu1 %v9874_v3 }
 0x402   : > { %9123 = vmatpush3.bf16.msra.mxu1 %v10185_v31 }
 0x403   : > { %9124 = vmatprep.subr.bf16.mxu1 %v9874_v3 }
 0x406   : > { %9126 = vmatpush3.bf16.msra.mxu1 %v10199_v46 }
 0x407   : > { %9127 = vmatprep.subr.bf16.mxu1 %v9874_v3 }
 0x40a   : > { %9129 = vmatpush3.bf16.msra.mxu1 %v10213_v51 }
 0x40b   : > { %9130 = vmatprep.subr.bf16.mxu1 %v9874_v3 }
 0x40e   : > { %9132 = vmatpush3.bf16.msra.mxu1 %v10215_v52 }
 0x40f   : > { %9133 = vmatprep.subr.bf16.mxu1 %v9874_v3 }
 0x412   : > { %9135 = vmatpush3.bf16.msra.mxu1 %v10217_v53 }
 0x413   : > { %9136 = vmatprep.subr.bf16.mxu1 %v9874_v3 }
 0x415   : > { %7828 = vmatmul.mubr.f32.vlgmr.msra.gmra.mrb[4].mxu1 %v3723_v26 }
 0x416   : > { %9138 = vmatpush3.bf16.msra.mxu1 %v10272_v29  ;;  %7862 = vmatprep.mubr.msk.f32.mxu1 %vm9875_vm0, %v9876_v8 }
 0x417   : > { %9139 = vmatprep.subr.bf16.mxu1 %v9874_v3 }
 0x41a   : > { %9141 = vmatpush3.bf16.msra.mxu1 %v10274_v32 }
 0x41b   : > { %9142 = vmatprep.subr.bf16.mxu1 %v9874_v3 }
 0x41e   : > { %9144 = vmatpush3.bf16.msra.mxu1 %v10277_v33 }
 0x41f   : > { %9145 = vmatprep.subr.bf16.mxu1 %v9874_v3 }
 0x422   : > { %9147 = vmatpush3.bf16.msra.mxu1 %v10279_v34 }
 0x423   : > { %9148 = vmatprep.subr.bf16.mxu1 %v9874_v3 }
 0x426   : > { %9150 = vmatpush3.bf16.msra.mxu1 %v10281_v35 }
 0x427   : > { %9151 = vmatprep.subr.bf16.mxu1 %v9874_v3 }
 0x42a   : > { %9153 = vmatpush3.bf16.msra.mxu1 %v10283_v38 }
 0x42b   : > { %9154 = vmatprep.subr.bf16.mxu1 %v9874_v3 }
 0x42e   : > { %9156 = vmatpush3.bf16.msra.mxu1 %v10286_v39 }
 0x42f   : > { %9157 = vmatprep.subr.bf16.mxu1 %v9874_v3 }
 0x432   : > { %9159 = vmatpush3.bf16.msra.mxu1 %v10288_v40 }
 0x433   : > { %9160 = vmatprep.subr.bf16.mxu1 %v9874_v3 }
 0x435   : > { %7863 = vmatmul.mubr.f32.vlgmr.msra.gmra.mrb[4].mxu1 %v11094_v23 }
 0x436   : > { %9162 = vmatpush3.bf16.msra.mxu1 %v10163_v12  ;;  %7897 = vmatprep.mubr.msk.f32.mxu1 %vm9875_vm0, %v9876_v8 }
 0x437   : > { %9163 = vmatprep.subr.bf16.mxu1 %v9874_v3 }
 0x43a   : > { %9165 = vmatpush3.bf16.msra.mxu1 %v10166_v13 }
 0x43b   : > { %9166 = vmatprep.subr.bf16.mxu1 %v9874_v3 }
 0x43e   : > { %9168 = vmatpush3.bf16.msra.mxu1 %v10175_v20 }
 0x43f   : > { %9169 = vmatprep.subr.bf16.mxu1 %v9874_v3 }
 0x442   : > { %9171 = vmatpush3.bf16.msra.mxu1 %v10185_v31 }
 0x443   : > { %9172 = vmatprep.subr.bf16.mxu1 %v9874_v3 }
 0x446   : > { %9174 = vmatpush3.bf16.msra.mxu1 %v10199_v46 }
 0x447   : > { %9175 = vmatprep.subr.bf16.mxu1 %v9874_v3 }
 0x44a   : > { %9177 = vmatpush3.bf16.msra.mxu1 %v10213_v51 }
 0x44b   : > { %9178 = vmatprep.subr.bf16.mxu1 %v9874_v3 }
 0x44e   : > { %9180 = vmatpush3.bf16.msra.mxu1 %v10215_v52 }
 0x44f   : > { %9181 = vmatprep.subr.bf16.mxu1 %v9874_v3 }
 0x452   : > { %9183 = vmatpush3.bf16.msra.mxu1 %v10217_v53 }
 0x453   : > { %9328 = vmatprep.subr.bf16.mxu1 %v9874_v3 }
 0x455   : > { %7898 = vmatmul.mubr.f32.vlgmr.msra.gmra.mrb[4].mxu1 %v11094_v23 }
 0x456   : > { %9330 = vmatpush3.bf16.msra.mxu1 %v10163_v12  ;;  %8142 = vmatprep.mubr.msk.f32.mxu1 %vm9875_vm0, %v9876_v8 }
 0x457   : > { %9331 = vmatprep.subr.bf16.mxu1 %v9874_v3 }
 0x45a   : > { %9333 = vmatpush3.bf16.msra.mxu1 %v10166_v13 }
 0x45b   : > { %9334 = vmatprep.subr.bf16.mxu1 %v9874_v3 }
 0x45e   : > { %9336 = vmatpush3.bf16.msra.mxu1 %v10175_v20 }
 0x45f   : > { %9337 = vmatprep.subr.bf16.mxu1 %v9874_v3 }
 0x462   : > { %9339 = vmatpush3.bf16.msra.mxu1 %v10185_v31 }
 0x463   : > { %9340 = vmatprep.subr.bf16.mxu1 %v9874_v3 }
 0x464   : > { %v4952_v22 = vpop.f32.mrb[6].mxu0 }
 0x465   : > { %v4956_v55 = vmul.f32 0.0625, %v4952_v22  ;;  %v8109_v23 = vpop.f32.mrb[7].mxu0 }
 0x466   : > { %9342 = vmatpush3.bf16.msra.mxu1 %v10199_v46 }
 0x467   : > { %v11238_v59 = vsub.f32 %v10828_v7, %v4956_v55  ;;  %9343 = vmatprep.subr.bf16.mxu1 %v9874_v3 }
 0x468   : > { %v2958_v5 = vpop.f32.mrb[2].mxu1 }
 0x469   : > { %v4958_v26 = vmul.f32 %v11238_v59, %v11238_v59  ;;  %v2962_v50 = vmul.f32 0.0625, %v2958_v5  ;;  %v7479_v60 = vpop.f32.mrb[3].mxu1 }
 0x46a   : > { %9345 = vmatpush3.bf16.msra.mxu1 %v10213_v51  ;;  %v5616_v60 = vstv %s5811_s4 }
 0x46b   : > { %v11244_v37 = vand.u32 4294901760, %v4958_v26  ;;  %v2965_v62 = vmul.f32 %v2964_v24, %v2962_v50  ;;  %9346 = vmatprep.subr.bf16.mxu1 %v9874_v3 }
 0x46d   : > { %v11248_v7 = vsub.f32 %v4958_v26, %v11244_v37  ;;  %v2966_v63 = vadd.f32 4.0, %v2965_v62  ;;  %v5614_v26 = vstv %s5810_s27 }
 0x46e   : > { %9348 = vmatpush3.bf16.msra.mxu1 %v10215_v52 }
 0x46f   : > { %9655 = vrsqrt.f32 %v2966_v63  ;;  %9349 = vmatprep.subr.bf16.mxu1 %v9874_v3  ;;  %v5042_v2 = vand.u32 4294901760, %v11248_v7 }
 0x471   : > { %v5043_v61 = vsub.f32 %v11248_v7, %v5042_v2 }
 0x472   : > { %9351 = vmatpush3.bf16.msra.mxu1 %v10217_v53 }
 0x473   : > { %9352 = vmatprep.subr.bf16.mxu1 %v9874_v3  ;;  %v5044_v9 = vand.u32 4294901760, %v5043_v61 }
 0x475   : > { %8143 = vmatmul.mubr.f32.vlgmr.msra.gmra.mrb[6].mxu1 %v5044_v9 }
 0x476   : > { %9354 = vmatpush3.bf16.msra.mxu1 %v10294_v43  ;;  %8177 = vmatprep.mubr.msk.f32.mxu1 %vm9875_vm0, %v9876_v8 }
 0x477   : > { %9355 = vmatprep.subr.bf16.mxu1 %v9874_v3 }
 0x479   : > { %v9656_v15 = vpop.eup %9655 }
 0x47a   : > { %v2969_v42 = vmul.f32 %v9656_v15, %v2968_v10  ;;  %9357 = vmatpush3.bf16.msra.mxu1 %v10302_v57 }
 0x47b   : > { %9358 = vmatprep.subr.bf16.mxu1 %v9874_v3 }
 0x47c   : > { %v2970_v16 = vmul.f32 %v2969_v42, %v10853_v0 }
 0x47e   : > { %v2971_v17 = vmul.f32 %v11117_v1, %v2970_v16  ;;  %9360 = vmatpush3.bf16.msra.mxu1 %v10309_v11 }
 0x47f   : > { %9361 = vmatprep.subr.bf16.mxu1 %v9874_v3 }
 0x480   : > { %v2972_v43 = vadd.f32 %v11124_v4, %v2971_v17 }
 0x482   : > { %vm2973_vm2 = vcmp.gt.f32.partialorder %v2972_v43, 0.0  ;;  %v2974_v41 = vmul.f32 0.25, %v2972_v43  ;;  %9363 = vmatpush3.bf16.msra.mxu1 %v10316_v18 }
 0x483   : > { %9364 = vmatprep.subr.bf16.mxu1 %v9874_v3 }
 0x484   : > { %v2975_v57 = vsel %vm2973_vm2, %v2972_v43, %v2974_v41 }
 0x485   : > { %v2977_v54 = vmul.f32 %v2976_v44, %v2975_v57 }
 0x486   : > { %9366 = vmatpush3.bf16.msra.mxu1 %v10322_v19 }
 0x487   : > { %v2979_v0 = vadd.f32 %v2978_v21, %v2977_v54  ;;  %9367 = vmatprep.subr.bf16.mxu1 %v9874_v3 }
 0x489   : > { %v5800_v11 = vmul.f32 -1.442695, %v2979_v0 }
 0x48a   : > { %9369 = vmatpush3.bf16.msra.mxu1 %v10328_v58 }
 0x48b   : > { %9657 = vpow2.f32 %v5800_v11  ;;  %9370 = vmatprep.subr.bf16.mxu1 %v9874_v3 }
 0x48e   : > { %9372 = vmatpush3.bf16.msra.mxu1 %v10333_v6 }
 0x48f   : > { %9373 = vmatprep.subr.bf16.mxu1 %v9874_v3 }
 0x492   : > { %9375 = vmatpush3.bf16.msra.mxu1 %v10337_v27 }
 0x493   : > { %9376 = vmatprep.subr.bf16.mxu1 %v9874_v3 }
 0x495   : > { %v9658_v18 = vpop.eup %9657  ;;  %8178 = vmatmul.mubr.f32.vlgmr.msra.gmra.mrb[6].mxu1 %v11244_v37 }
 0x496   : > { %9378 = vmatpush3.bf16.msra.mxu1 %v10343_v28  ;;  %8212 = vmatprep.mubr.msk.f32.mxu1 %vm9875_vm0, %v9876_v8  ;;  %v2983_v19 = vadd.f32 1.0, %v9658_v18 }
 0x497   : > { %9379 = vmatprep.subr.bf16.mxu1 %v9874_v3 }
 0x498   : > { %9659 = vrcp.f32 %v2983_v19 }
 0x49a   : > { %9381 = vmatpush3.bf16.msra.mxu1 %v10350_v14 }
 0x49b   : > { %9382 = vmatprep.subr.bf16.mxu1 %v9874_v3 }
 0x49e   : > { %9384 = vmatpush3.bf16.msra.mxu1 %v10358_v30 }
 0x49f   : > { %9385 = vmatprep.subr.bf16.mxu1 %v9874_v3 }
 0x4a2   : > { %v9660_v58 = vpop.eup %9659  ;;  %9387 = vmatpush3.bf16.msra.mxu1 %v10364_v36  ;;  %v5602_v36 = vstv %s5601_s12 }
 0x4a3   : > { %9388 = vmatprep.subr.bf16.mxu1 %v9874_v3  ;;  %5801 = vst [vmem:[%s11152_s13 + $0x2] sm:$0x3] %v9660_v58 }
 0x4a6   : > { %9390 = vmatpush3.bf16.msra.mxu1 %v10370_v45 }
 0x4a7   : > { %9391 = vmatprep.subr.bf16.mxu1 %v9874_v3 }
 0x4aa   : > { %9393 = vmatpush3.bf16.msra.mxu1 %v10376_v48 }
 0x4ab   : > { %9394 = vmatprep.subr.bf16.mxu1 %v9874_v3 }
 0x4ae   : > { %9396 = vmatpush3.bf16.msra.mxu1 %v10382_v49 }
 0x4af   : > { %9397 = vmatprep.subr.bf16.mxu1 %v9874_v3 }
 0x4b2   : > { %9399 = vmatpush3.bf16.msra.mxu1 %v10388_v56 }
 0x4b3   : > { %9400 = vmatprep.subr.bf16.mxu1 %v9874_v3 }
 0x4b5   : > { %8213 = vmatmul.mubr.f32.vlgmr.msra.gmra.mrb[6].mxu1 %v11248_v7 }
 0x4b6   : > { %9402 = vmatpush3.bf16.msra.mxu1 %v10163_v12  ;;  %8247 = vmatprep.mubr.msk.f32.mxu1 %vm9875_vm0, %v9876_v8 }
 0x4b7   : > { %9403 = vmatprep.subr.bf16.mxu1 %v9874_v3 }
 0x4ba   : > { %9405 = vmatpush3.bf16.msra.mxu1 %v10166_v13 }
 0x4bb   : > { %9406 = vmatprep.subr.bf16.mxu1 %v9874_v3 }
 0x4be   : > { %9408 = vmatpush3.bf16.msra.mxu1 %v10175_v20 }
 0x4bf   : > { %9409 = vmatprep.subr.bf16.mxu1 %v9874_v3 }
 0x4c2   : > { %9411 = vmatpush3.bf16.msra.mxu1 %v10185_v31 }
 0x4c3   : > { %9412 = vmatprep.subr.bf16.mxu1 %v9874_v3 }
 0x4c6   : > { %9414 = vmatpush3.bf16.msra.mxu1 %v10199_v46 }
 0x4c7   : > { %9415 = vmatprep.subr.bf16.mxu1 %v9874_v3 }
 0x4ca   : > { %9417 = vmatpush3.bf16.msra.mxu1 %v10213_v51 }
 0x4cb   : > { %9418 = vmatprep.subr.bf16.mxu1 %v9874_v3 }
 0x4ce   : > { %9420 = vmatpush3.bf16.msra.mxu1 %v10215_v52 }
 0x4cf   : > { %9421 = vmatprep.subr.bf16.mxu1 %v9874_v3 }
 0x4d2   : > { %9423 = vmatpush3.bf16.msra.mxu1 %v10217_v53 }
 0x4d3   : > { %9424 = vmatprep.subr.bf16.mxu1 %v9874_v3 }
 0x4d5   : > { %8248 = vmatmul.mubr.f32.vlgmr.msra.gmra.mrb[6].mxu1 %v5042_v2 }
 0x4d6   : > { %9426 = vmatpush3.bf16.msra.mxu1 %v10272_v29  ;;  %8282 = vmatprep.mubr.msk.f32.mxu1 %vm9875_vm0, %v9876_v8 }
 0x4d7   : > { %9427 = vmatprep.subr.bf16.mxu1 %v9874_v3 }
 0x4da   : > { %9429 = vmatpush3.bf16.msra.mxu1 %v10274_v32 }
 0x4db   : > { %9430 = vmatprep.subr.bf16.mxu1 %v9874_v3 }
 0x4de   : > { %9432 = vmatpush3.bf16.msra.mxu1 %v10277_v33 }
 0x4df   : > { %9433 = vmatprep.subr.bf16.mxu1 %v9874_v3 }
 0x4e2   : > { %9435 = vmatpush3.bf16.msra.mxu1 %v10279_v34  ;;  %v4295_v34 = vstv %s5803_s8 }
 0x4e3   : > { %9436 = vmatprep.subr.bf16.mxu1 %v9874_v3 }
 0x4e6   : > { %9438 = vmatpush3.bf16.msra.mxu1 %v10281_v35 }
 0x4e7   : > { %9439 = vmatprep.subr.bf16.mxu1 %v9874_v3 }
 0x4ea   : > { %9441 = vmatpush3.bf16.msra.mxu1 %v10283_v38  ;;  %v4297_v38 = vstv %s5804_s17 }
 0x4eb   : > { %9442 = vmatprep.subr.bf16.mxu1 %v9874_v3 }
 0x4ee   : > { %9444 = vmatpush3.bf16.msra.mxu1 %v10286_v39 }
 0x4ef   : > { %9445 = vmatprep.subr.bf16.mxu1 %v9874_v3 }
 0x4f2   : > { %9447 = vmatpush3.bf16.msra.mxu1 %v10288_v40 }
 0x4f3   : > { %9448 = vmatprep.subr.bf16.mxu1 %v9874_v3 }
 0x4f5   : > { %8283 = vmatmul.mubr.f32.vlgmr.msra.gmra.mrb[6].mxu1 %v11244_v37 }
 0x4f6   : > { %9450 = vmatpush3.bf16.msra.mxu1 %v10163_v12  ;;  %8317 = vmatprep.mubr.msk.f32.mxu1 %vm9875_vm0, %v9876_v8  ;;  %v4283_v12 = vstv %s4282_s25 }
 0x4f7   : > { %9451 = vmatprep.subr.bf16.mxu1 %v9874_v3 }
 0x4fa   : > { %9453 = vmatpush3.bf16.msra.mxu1 %v10166_v13 }
 0x4fb   : > { %9454 = vmatprep.subr.bf16.mxu1 %v9874_v3 }
 0x4fe   : > { %9456 = vmatpush3.bf16.msra.mxu1 %v10175_v20 }
 0x4ff   : > { %9457 = vmatprep.subr.bf16.mxu1 %v9874_v3 }
 0x502   : > { %9459 = vmatpush3.bf16.msra.mxu1 %v10185_v31 }
 0x503   : > { %9460 = vmatprep.subr.bf16.mxu1 %v9874_v3 }
 0x506   : > { %9462 = vmatpush3.bf16.msra.mxu1 %v10199_v46 }
 0x507   : > { %9463 = vmatprep.subr.bf16.mxu1 %v9874_v3 }
 0x50a   : > { %9465 = vmatpush3.bf16.msra.mxu1 %v10213_v51  ;;  %v4287_v51 = vstv %s5802_s11  ;;  %s9778_s11 = sshll.u32 %s9877_s21, 4  ;;  %s9779_s11 = int_to_ptr.vmem [resolvable:$false] %s9778_s11 }
 0x50b   : > { %9466 = vmatprep.subr.bf16.mxu1 %v9874_v3  ;;  %s9780_s25 = scalar_lea.vmem %s9779_s11, 256  ;;  %p9781_p6 = scmp.lt.s32.totalorder %s11372_s10, %s9779_s11 }
 0x50c   : > { %p9782_p8 = scmp.lt.s32.totalorder %s9780_s25, %s9774_s7 }
 0x50e   : > { %9468 = vmatpush3.bf16.msra.mxu1 %v10215_v52  ;;  %p9783_p13 = por %p9782_p8, %p9781_p6 }
 0x50f   : > { %9469 = vmatprep.subr.bf16.mxu1 %v9874_v3 }
 0x510   : > { %p9784_p4 = pnand %p9783_p13, %p9777_p9 }
 0x512   : > { %9471 = vmatpush3.bf16.msra.mxu1 %v10217_v53 }
 0x515   : > { %8318 = vmatmul.mubr.f32.vlgmr.msra.gmra.mrb[6].mxu1 %v11244_v37 }
 0x528   : > { %v4277_v8 = vpop.f32.mrb[4].mxu1 }
 0x529   : > { %v4281_v13 = vmul.f32 0.0625, %v4277_v8  ;;  %v7899_v20 = vpop.f32.mrb[5].mxu1 }
 0x52b   : > { %v4284_v31 = vmul.f32 %v4283_v12, %v4281_v13 }
 0x52d   : > { %v4285_v46 = vadd.f32 4.0, %v4284_v31 }
 0x52f   : > { %9661 = vrsqrt.f32 %v4285_v46 }
 0x539   : > { %v9662_v29 = vpop.eup %9661 }
 0x53a   : > { %v4288_v32 = vmul.f32 %v9662_v29, %v4287_v51 }
 0x53c   : > { %v4289_v3 = vmul.f32 %v4288_v32, %v11088_v47  ;;  %v5606_v47 = vstv %s5809_s26 }
 0x53e   : > { %v4290_v52 = vmul.f32 %v11117_v1, %v4289_v3 }
 0x540   : > { %v4291_v53 = vadd.f32 %v11124_v4, %v4290_v52 }
 0x542   : > { %vm4292_vm3 = vcmp.gt.f32.partialorder %v4291_v53, 0.0  ;;  %v4293_v33 = vmul.f32 0.25, %v4291_v53 }
 0x544   : > { %v4294_v35 = vsel %vm4292_vm3, %v4291_v53, %v4293_v33 }
 0x545   : > { %v4296_v39 = vmul.f32 %v4295_v34, %v4294_v35 }
 0x547   : > { %v4298_v40 = vadd.f32 %v4297_v38, %v4296_v39 }
 0x549   : > { %v5807_v6 = vmul.f32 -1.442695, %v4298_v40 }
 0x54b   : > { %9663 = vpow2.f32 %v5807_v6 }
 0x555   : > { %v9664_v27 = vpop.eup %9663 }
 0x556   : > { %v4302_v28 = vadd.f32 1.0, %v9664_v27 }
 0x558   : > { %9665 = vrcp.f32 %v4302_v28 }
 0x562   : > { %v9666_v14 = vpop.eup %9665 }
 0x563   : > { %5808 = vst [vmem:[%s11152_s13 + $0x4] sm:$0x3] %v9666_v14 }
 0x5e8   : > { %v5596_v30 = vpop.f32.mrb[6].mxu1 }
 0x5e9   : > { %v5600_v45 = vmul.f32 0.0625, %v5596_v30  ;;  %v8319_v48 = vpop.f32.mrb[7].mxu1 }
 0x5eb   : > { %v5603_v49 = vmul.f32 %v5602_v36, %v5600_v45 }
 0x5ed   : > { %v5604_v56 = vadd.f32 4.0, %v5603_v49 }
 0x5ef   : > { %9667 = vrsqrt.f32 %v5604_v56 }
 0x5f9   : > { %v9668_v25 = vpop.eup %9667 }
 0x5fa   : > { %v5607_v22 = vmul.f32 %v9668_v25, %v5606_v47 }
 0x5fc   : > { %v5608_v55 = vmul.f32 %v5607_v22, %v11238_v59 }
 0x5fe   : > { %v5609_v23 = vmul.f32 %v11117_v1, %v5608_v55 }
 0x600   : > { %v5610_v5 = vadd.f32 %v11124_v4, %v5609_v23 }
 0x602   : > { %vm5611_vm4 = vcmp.gt.f32.partialorder %v5610_v5, 0.0  ;;  %v5612_v24 = vmul.f32 0.25, %v5610_v5 }
 0x604   : > { %v5613_v50 = vsel %vm5611_vm4, %v5610_v5, %v5612_v24 }
 0x605   : > { %v5615_v37 = vmul.f32 %v5614_v26, %v5613_v50 }
 0x607   : > { %v5617_v62 = vadd.f32 %v5616_v60, %v5615_v37 }
 0x609   : > { %v5814_v7 = vmul.f32 -1.442695, %v5617_v62 }
 0x60b   : > { %9669 = vpow2.f32 %v5814_v7 }
 0x615   : > { %v9670_v63 = vpop.eup %9669 }
 0x616   : > { %v5621_v2 = vadd.f32 1.0, %v9670_v63 }
 0x618   : > { %9671 = vrcp.f32 %v5621_v2 }
 0x622   : > { %v9672_v1 = vpop.eup %9671 }
 0x623   : > { %5815 = vst [vmem:[%s11152_s13 + $0x6] sm:$0x3] %v9672_v1 }
 0x624   : > { %9787 = shalt.err (!%p9784_p4)
}
 0x625   : > { %s9788_s29 = scalar_lea.hbm %s11370_s28, 128  ;;  %s9792_s17 = scalar_lea.hbm %s11429_s5, 256 }
 0x626   : > { %p9789_p7 = scmp.ne.s32.totalorder %s11370_s28, %s9788_s29  ;;  %p9793_p3 = scmp.lt.u32.totalorder %s11370_s28, %s11429_s5 }
 0x627   : > { %p9794_p2 = scmp.lt.u32.totalorder %s9792_s17, %s9788_s29  ;;  %p9796_p5 = scmp.lt.u32.totalorder %s9788_s29, %s11370_s28 }
 0x628   : > { %p9790_p11 = pnand %p9789_p7, %p11454_p12 }
 0x629   : > { %p9795_p0 = por %p9794_p2, %p9793_p3 }
 0x62a   : > { %p9791_p1 = pneg %p9790_p11 }
 0x62b   : > { %p9797_p10 = por %p9796_p5, %p9795_p0 }
 0x62d   : > { %p9798_p9 = pnand %p9797_p10, %p9791_p1 }
 0x62f   : > { %9801 = shalt.err (!%p9798_p9)
}
 0x630   : > { %s9878_s27 = smov 32   ;;  %s9879_s4 = smov 2  }
 0x631   : > { %9564 = dma.vmem_to_hbm [thread:$0]  (%p11454_p12), %s11372_s10, 128, %s11370_s28, %s11377_s15, %s9878_s27, %s9878_s27, %s9879_s4  }
 0x632 PF: > { %s5656_s3 = sand.u32 1, %s9844_s18   ;;  %p11455_p6 = scmp.ne.s32.totalorder %s11442_s9, 0 }
 0x633   : > { %p11456_p8 = scmp.ge.s32.totalorder %s9864_s23, 2  ;;  %s5657_s14 = scalar_lea.sflag [#allocation4], %s5656_s3 }
 0x635   : > { %p9581_p13 = pnand %p11456_p8, %p11455_p6 }
 0x637   : > { %9839 = dma.done.wait (!%p9581_p13), %s5657_s14, 128  }
 0x638   : > { %9841 = vsyncadd (!%p9581_p13), %s5657_s14, 4294967168  ;;  %s23_s23 = sadd.s32 1, %s9864_s23   ;;  %s11457_s18 = smov %s9848_s19 }
 0x639   : > { %p20_p4 = scmp.ge.s32.totalorder %s23_s23, 4   ;;  %s11458_s19 = smov %s9852_s20 }
 0x63a   : > { %s11459_s20 = smov %s9958_s30  ;;  %s11460_s21 = smov %s9860_s22 }
 0x63b   : > { %s11461_s22 = smov %s11463_s24  ;;  %22 = sbr.rel (!%p20_p4) target bundleno = 11 (0xb), region = 115 }
 0x642   :  { %5662 = vsyncpa [#allocation3], 1 }
 0x643   :  { %5664 = vsyncpa [#allocation3 + $0x1], 1 }
 0x644   :  { %5665 = vsyncpa [#allocation8], 1 }
 0x645   :  { %5667 = vsyncpa [#allocation8 + $0x1], 1 }
 0x646   :  { %5668 = vsyncpa [#allocation4], 1 }
 0x647   :  { %5670 = vsyncpa [#allocation4 + $0x1], 1 }
 0x648   :  { %5671 = vsyncpa [#allocation5], 1 }
 0x649   :  { %5673 = vsyncpa [#allocation5 + $0x1], 1 }

</bundles_post_ra>
